<compile_context>
chip_gen: v7x
topology: tpu7x:2x2x1
jax: 0.10.0
libtpu: 0.0.40
codegen_flags: <defaults>
</compile_context>

<pallas_src>
import jax
import jax.numpy as jnp
from jax.experimental import pallas as pl
from jax.experimental.pallas import tpu as pltpu  # noqa: F401  (TPU backend / params)

# ----------------------------- config ---------------------------------------
VOCAB_SIZE = 50
MAX_LEN    = 8          # sequence length == max_len
D_MODEL    = 32
N_HEADS    = 4
D_K        = D_MODEL // N_HEADS
D_FF       = 64
N_LAYERS   = 2
BATCH      = 2
LN_EPS     = 1e-5       # nn.LayerNorm default

BS      = BATCH * MAX_LEN        # folded (batch * seq) rows
SEG_OFF = VOCAB_SIZE             # 50: segment rows start here in the embedding slab
POS_OFF = VOCAB_SIZE + 2         # 52: positional rows start here
LNG_ROW = POS_OFF + MAX_LEN      # 60: embedding LayerNorm gamma row
LNB_ROW = LNG_ROW + 1            # 61: embedding LayerNorm beta row
N_TAB   = 64                     # embedding slab rows (padded to a multiple of 8)

# rows of the per-layer vector slab (L, 8, 128)
ROW_BQKV, ROW_BO, ROW_LN1G, ROW_LN1B, ROW_B1, ROW_B2, ROW_LN2G, ROW_LN2B = range(8)


# ----------------------------- kernel ----------------------------------------
def bert_kernel(ids_ref, mask_ref, emb_ref, vecs_ref, wattn_ref, wffn_ref, o_ref):
    """Full BERT forward (all batch elements, all layers) in one program."""
    f32 = jnp.float32

    def layer_norm(h, g, b):
        mean = jnp.mean(h, axis=-1, keepdims=True)
        var = jnp.mean((h - mean) ** 2, axis=-1, keepdims=True)
        return (h - mean) * jax.lax.rsqrt(var + LN_EPS) * g + b

    def erf(z):
        # Abramowitz-Stegun 7.1.26, |err| <= 1.5e-7 -> matches torch erf-exact GELU.
        az = jnp.abs(z)
        t = 1.0 / (1.0 + 0.3275911 * az)
        poly = t * (0.254829592 + t * (-0.284496736 + t * (1.421413741
                    + t * (-1.453152027 + t * 1.061405429))))
        y = 1.0 - poly * jnp.exp(-az * az)
        return jnp.where(z >= 0.0, y, -y)

    # ---- embedding: one-hot built in-kernel, single matmul against combined slab ----
    ids = ids_ref[...]                                               # (BS, 3) int32
    col = jax.lax.broadcasted_iota(jnp.int32, (BS, N_TAB), 1)
    hit = (col == ids[:, 0:1]) | (col == ids[:, 1:2]) | (col == ids[:, 2:3])
    oh = jnp.where(hit, f32(1.0), f32(0.0))                          # (BS, N_TAB)
    x = jnp.dot(oh, emb_ref[...], preferred_element_type=f32)       # (BS, D)
    x = layer_norm(x,
                   emb_ref[LNG_ROW:LNG_ROW + 1, :],
                   emb_ref[LNB_ROW:LNB_ROW + 1, :])

    # Loop invariants: combined (pad-key | cross-batch) mask and q scale.
    banned = mask_ref[...] > 0.5                                     # (BS, BS) bool
    neg_big = f32(-1e9)
    inv_sqrt_dk = f32(1.0 / (float(D_K) ** 0.5))

    # ---- encoder layers: static unroll, all weights resident in VMEM ----
    for l in range(N_LAYERS):
        wqkv = wattn_ref[l, :, 0:3 * D_MODEL]                        # (D, 3D)
        wo   = wattn_ref[l, :, 3 * D_MODEL:4 * D_MODEL]              # (D, D)
        w1   = wffn_ref[l, 0:D_MODEL, :]                             # (D, D_FF)
        w2   = wffn_ref[l, D_MODEL:D_MODEL + D_FF, 0:D_MODEL]        # (D_FF, D)

        bqkv = vecs_ref[l, ROW_BQKV:ROW_BQKV + 1, 0:3 * D_MODEL]     # (1, 3D)
        bo   = vecs_ref[l, ROW_BO:ROW_BO + 1, 0:D_MODEL]
        ln1g = vecs_ref[l, ROW_LN1G:ROW_LN1G + 1, 0:D_MODEL]
        ln1b = vecs_ref[l, ROW_LN1B:ROW_LN1B + 1, 0:D_MODEL]
        b1   = vecs_ref[l, ROW_B1:ROW_B1 + 1, 0:D_FF]
        b2   = vecs_ref[l, ROW_B2:ROW_B2 + 1, 0:D_MODEL]
        ln2g = vecs_ref[l, ROW_LN2G:ROW_LN2G + 1, 0:D_MODEL]
        ln2b = vecs_ref[l, ROW_LN2B:ROW_LN2B + 1, 0:D_MODEL]

        # fused Q/K/V projection over the whole folded batch: (BS, D) x (D, 3D)
        qkv = jnp.dot(x, wqkv, preferred_element_type=f32) + bqkv    # (BS, 3D)

        def heads(off):
            # static lane slices -> (H, BS, DK); heads batched, batch stays folded in BS
            return jnp.stack([qkv[:, off + h * D_K: off + (h + 1) * D_K]
                              for h in range(N_HEADS)], axis=0)

        qh = heads(0) * inv_sqrt_dk                                  # (H, BS, DK)
        kh = heads(D_MODEL)
        vh = heads(2 * D_MODEL)

        # all heads, all batch rows at once; mask kills PAD keys + cross-batch entries
        s = jnp.einsum('hqd,hkd->hqk', qh, kh,
                       preferred_element_type=f32)                   # (H, BS, BS)
        s = jnp.where(banned, neg_big, s)
        s = s - jnp.max(s, axis=-1, keepdims=True)
        p = jnp.exp(s)
        p = p * pl.reciprocal(jnp.sum(p, axis=-1, keepdims=True), approx=True)
        ctx = jnp.einsum('hqk,hkd->hqd', p, vh,
                         preferred_element_type=f32)                 # (H, BS, DK)
        ctx = jnp.concatenate([ctx[h] for h in range(N_HEADS)], axis=-1)  # (BS, D)

        # output projection + residual + LayerNorm 1
        attn = jnp.dot(ctx, wo, preferred_element_type=f32) + bo
        h1 = layer_norm(x + attn, ln1g, ln1b)

        # position-wise FFN with erf-exact GELU + residual + LayerNorm 2
        f = jnp.dot(h1, w1, preferred_element_type=f32) + b1
        f = 0.5 * f * (1.0 + erf(f * f32(0.7071067811865476)))
        f = jnp.dot(f, w2, preferred_element_type=f32) + b2
        x = layer_norm(h1 + f, ln2g, ln2b)

    o_ref[...] = x.astype(o_ref.dtype)


# ----------------------------- wrapper ----------------------------------------
def bert_forward(params, input_ids, segment_ids):
    B, S = input_ids.shape
    assert (B, S) == (BATCH, MAX_LEN)

    # tiny driver tensors (replace the old one-hot arrays): table indices + combined mask
    pos = jnp.tile(jnp.arange(S, dtype=jnp.int32), B)
    ids = jnp.stack([input_ids.reshape(-1).astype(jnp.int32),
                     segment_ids.reshape(-1).astype(jnp.int32) + SEG_OFF,
                     pos + POS_OFF], axis=1)                         # (B*S, 3)

    flat_pad = (input_ids.reshape(-1) == 0)
    bidx = jnp.repeat(jnp.arange(B, dtype=jnp.int32), S)
    banned = (bidx[:, None] != bidx[None, :]) | flat_pad[None, :]    # pad keys / other batch
    mask = banned.astype(jnp.float32)                                # (B*S, B*S)

    def _full(shape):
        n = len(shape)
        return pl.BlockSpec(shape, lambda *_: (0,) * n)              # whole array, no grid

    out = pl.pallas_call(
        bert_kernel,
        out_shape=jax.ShapeDtypeStruct((B * S, D_MODEL), jnp.float32),
        in_specs=[_full(ids.shape), _full(mask.shape),
                  _full(params['emb'].shape), _full(params['vecs'].shape),
                  _full(params['wattn'].shape), _full(params['wffn'].shape)],
        out_specs=_full((B * S, D_MODEL)),
    )(ids, mask, params['emb'], params['vecs'], params['wattn'], params['wffn'])

    return out.reshape(B, S, D_MODEL)


# ----------------------------- param init ------------------------------------
def init_params(key):
    keys = iter(jax.random.split(key, 32))

    def nrm(shape, scale=0.02):
        return jax.random.normal(next(keys), shape, jnp.float32) * scale

    # embedding slab: [tok(50) | seg(2) | pos(8) | emb_ln_g | emb_ln_b | pad(2)] rows
    emb = jnp.zeros((N_TAB, D_MODEL), jnp.float32)
    emb = emb.at[0:VOCAB_SIZE].set(nrm((VOCAB_SIZE, D_MODEL)))
    emb = emb.at[SEG_OFF:SEG_OFF + 2].set(nrm((2, D_MODEL)))
    emb = emb.at[POS_OFF:POS_OFF + MAX_LEN].set(nrm((MAX_LEN, D_MODEL)))
    emb = emb.at[LNG_ROW].set(jnp.ones((D_MODEL,), jnp.float32))     # LN gamma
    # LNB_ROW (LN beta) and the 2 pad rows stay zero.

    # per-layer vector slab (L, 8, 128): biases zero, LayerNorm gammas one
    vecs = jnp.zeros((N_LAYERS, 8, 128), jnp.float32)
    vecs = vecs.at[:, ROW_LN1G, 0:D_MODEL].set(1.0)
    vecs = vecs.at[:, ROW_LN2G, 0:D_MODEL].set(1.0)

    # per-layer weight slabs
    wattn = jnp.zeros((N_LAYERS, D_MODEL, 128), jnp.float32)           # [Wq|Wk|Wv|Wo]
    wffn = jnp.zeros((N_LAYERS, D_MODEL + D_FF, D_FF), jnp.float32)    # [W1 ; W2(pad)]
    for l in range(N_LAYERS):
        for j in range(4):                                              # Wq, Wk, Wv, Wo
            wattn = wattn.at[l, :, j * D_MODEL:(j + 1) * D_MODEL].set(
                nrm((D_MODEL, D_MODEL)))
        wffn = wffn.at[l, 0:D_MODEL, :].set(nrm((D_MODEL, D_FF)))
        wffn = wffn.at[l, D_MODEL:, 0:D_MODEL].set(nrm((D_FF, D_MODEL)))

    return {'emb': emb, 'vecs': vecs, 'wattn': wattn, 'wffn': wffn}


# ----------------------------- main -------------------------------------------
if __name__ == "__main__":
    key = jax.random.PRNGKey(0)
    k_ids, k_params = jax.random.split(key)

    input_ids = jax.random.randint(k_ids, (BATCH, MAX_LEN), 1, VOCAB_SIZE,
                                   dtype=jnp.int32)
    input_ids = input_ids.at[:, -2:].set(0)              # trailing PAD tokens
    segment_ids = jnp.concatenate(
        [jnp.zeros((BATCH, MAX_LEN // 2), jnp.int32),
         jnp.ones((BATCH, MAX_LEN - MAX_LEN // 2), jnp.int32)], axis=1)

    params = init_params(k_params)

    fwd = jax.jit(bert_forward)
    out = jax.block_until_ready(fwd(params, input_ids, segment_ids))

    assert out.shape == (BATCH, MAX_LEN, D_MODEL)
    assert bool(jnp.all(jnp.isfinite(out)))
    print("KERNEL_OK")
</pallas_src>

<mosaic_0001>
module attributes {stable_mosaic.version = 11 : i64} {
  func.func @bert_kernel(%arg0: memref<16x3xi32, #tpu.memory_space<vmem>>, %arg1: memref<16x16xf32, #tpu.memory_space<vmem>>, %arg2: memref<64x32xf32, #tpu.memory_space<vmem>>, %arg3: memref<2x8x128xf32, #tpu.memory_space<vmem>>, %arg4: memref<2x32x128xf32, #tpu.memory_space<vmem>>, %arg5: memref<2x96x64xf32, #tpu.memory_space<vmem>>, %arg6: memref<16x32xf32, #tpu.memory_space<vmem>>) attributes {dimension_semantics = [], scalar_prefetch = 0 : i64, scratch_operands = 0 : i64, tpu.core_type = #tpu.core_type<tc>} {
    %c0 = arith.constant 0 : index
    %c0_0 = arith.constant 0 : index
    %0 = vector.load %arg0[%c0, %c0_0] : memref<16x3xi32, #tpu.memory_space<vmem>>, vector<16x3xi32>
    %1 = tpu.iota {dimensions = array<i32: 1>} : vector<16x64xi32>
    %2 = vector.extract_strided_slice %0 {offsets = [0, 0], sizes = [16, 1], strides = [1, 1]} : vector<16x3xi32> to vector<16x1xi32>
    %3 = vector.broadcast %2 : vector<16x1xi32> to vector<16x64xi32>
    %4 = arith.cmpi eq, %1, %3 : vector<16x64xi32>
    %5 = vector.extract_strided_slice %0 {offsets = [0, 1], sizes = [16, 1], strides = [1, 1]} : vector<16x3xi32> to vector<16x1xi32>
    %6 = vector.broadcast %5 : vector<16x1xi32> to vector<16x64xi32>
    %7 = arith.cmpi eq, %1, %6 : vector<16x64xi32>
    %8 = arith.ori %4, %7 : vector<16x64xi1>
    %9 = vector.extract_strided_slice %0 {offsets = [0, 2], sizes = [16, 1], strides = [1, 1]} : vector<16x3xi32> to vector<16x1xi32>
    %10 = vector.broadcast %9 : vector<16x1xi32> to vector<16x64xi32>
    %11 = arith.cmpi eq, %1, %10 : vector<16x64xi32>
    %12 = arith.ori %8, %11 : vector<16x64xi1>
    %cst = arith.constant 1.000000e+00 : f32
    %cst_1 = arith.constant 0.000000e+00 : f32
    %13 = vector.broadcast %cst : f32 to vector<16x64xf32>
    %14 = vector.broadcast %cst_1 : f32 to vector<16x64xf32>
    %15 = arith.select %12, %13, %14 : vector<16x64xi1>, vector<16x64xf32>
    %c0_2 = arith.constant 0 : index
    %c0_3 = arith.constant 0 : index
    %16 = vector.load %arg2[%c0_2, %c0_3] : memref<64x32xf32, #tpu.memory_space<vmem>>, vector<64x32xf32>
    %cst_4 = arith.constant dense<0.000000e+00> : vector<16x32xf32>
    %17 = tpu.matmul %15, %16, %cst_4 {dimension_numbers = #tpu.dot_dimension_numbers<[1], [0], [0], [1], [0, 0, 1, 1], [], []>} : vector<16x64xf32>, vector<64x32xf32>, vector<16x32xf32> -> vector<16x32xf32>
    %c60 = arith.constant 60 : index
    %c0_5 = arith.constant 0 : index
    %18 = vector.load %arg2[%c60, %c0_5] : memref<64x32xf32, #tpu.memory_space<vmem>>, vector<1x32xf32>
    %c61 = arith.constant 61 : index
    %c0_6 = arith.constant 0 : index
    %19 = vector.load %arg2[%c61, %c0_6] : memref<64x32xf32, #tpu.memory_space<vmem>>, vector<1x32xf32>
    %cst_7 = arith.constant dense<0.000000e+00> : vector<16xf32>
    %20 = vector.multi_reduction <add>, %17, %cst_7 [1] : vector<16x32xf32> to vector<16xf32>
    %21 = vector.shape_cast %20 : vector<16xf32> to vector<16x1xf32>
    %cst_8 = arith.constant 3.200000e+01 : f32
    %22 = vector.broadcast %cst_8 : f32 to vector<16x1xf32>
    %23 = arith.divf %21, %22 : vector<16x1xf32>
    %24 = vector.broadcast %23 : vector<16x1xf32> to vector<16x32xf32>
    %25 = arith.subf %17, %24 : vector<16x32xf32>
    %26 = arith.mulf %25, %25 : vector<16x32xf32>
    %cst_9 = arith.constant dense<0.000000e+00> : vector<16xf32>
    %27 = vector.multi_reduction <add>, %26, %cst_9 [1] : vector<16x32xf32> to vector<16xf32>
    %28 = vector.shape_cast %27 : vector<16xf32> to vector<16x1xf32>
    %cst_10 = arith.constant 3.200000e+01 : f32
    %29 = vector.broadcast %cst_10 : f32 to vector<16x1xf32>
    %30 = arith.divf %28, %29 : vector<16x1xf32>
    %31 = vector.broadcast %23 : vector<16x1xf32> to vector<16x32xf32>
    %32 = arith.subf %17, %31 : vector<16x32xf32>
    %cst_11 = arith.constant 9.99999974E-6 : f32
    %33 = vector.broadcast %cst_11 : f32 to vector<16x1xf32>
    %34 = arith.addf %30, %33 : vector<16x1xf32>
    %35 = math.rsqrt %34 : vector<16x1xf32>
    %36 = vector.broadcast %35 : vector<16x1xf32> to vector<16x32xf32>
    %37 = arith.mulf %32, %36 : vector<16x32xf32>
    %38 = vector.broadcast %18 : vector<1x32xf32> to vector<16x32xf32>
    %39 = arith.mulf %37, %38 : vector<16x32xf32>
    %40 = vector.broadcast %19 : vector<1x32xf32> to vector<16x32xf32>
    %41 = arith.addf %39, %40 : vector<16x32xf32>
    %c0_12 = arith.constant 0 : index
    %c0_13 = arith.constant 0 : index
    %42 = vector.load %arg1[%c0_12, %c0_13] : memref<16x16xf32, #tpu.memory_space<vmem>>, vector<16x16xf32>
    %cst_14 = arith.constant 5.000000e-01 : f32
    %43 = vector.broadcast %cst_14 : f32 to vector<16x16xf32>
    %44 = arith.cmpf ogt, %42, %43 : vector<16x16xf32>
    %c0_15 = arith.constant 0 : index
    %c0_16 = arith.constant 0 : index
    %c0_17 = arith.constant 0 : index
    %45 = vector.load %arg4[%c0_15, %c0_16, %c0_17] : memref<2x32x128xf32, #tpu.memory_space<vmem>>, vector<1x32x96xf32>
    %46 = vector.shape_cast %45 : vector<1x32x96xf32> to vector<32x96xf32>
    %c0_18 = arith.constant 0 : index
    %c0_19 = arith.constant 0 : index
    %c96 = arith.constant 96 : index
    %47 = vector.load %arg4[%c0_18, %c0_19, %c96] : memref<2x32x128xf32, #tpu.memory_space<vmem>>, vector<1x32x32xf32>
    %48 = vector.shape_cast %47 : vector<1x32x32xf32> to vector<32x32xf32>
    %c0_20 = arith.constant 0 : index
    %c0_21 = arith.constant 0 : index
    %c0_22 = arith.constant 0 : index
    %49 = vector.load %arg5[%c0_20, %c0_21, %c0_22] : memref<2x96x64xf32, #tpu.memory_space<vmem>>, vector<1x32x64xf32>
    %50 = vector.shape_cast %49 : vector<1x32x64xf32> to vector<32x64xf32>
    %c0_23 = arith.constant 0 : index
    %c32 = arith.constant 32 : index
    %c0_24 = arith.constant 0 : index
    %51 = vector.load %arg5[%c0_23, %c32, %c0_24] : memref<2x96x64xf32, #tpu.memory_space<vmem>>, vector<1x64x32xf32>
    %52 = vector.shape_cast %51 : vector<1x64x32xf32> to vector<64x32xf32>
    %c0_25 = arith.constant 0 : index
    %c0_26 = arith.constant 0 : index
    %c0_27 = arith.constant 0 : index
    %53 = vector.load %arg3[%c0_25, %c0_26, %c0_27] : memref<2x8x128xf32, #tpu.memory_space<vmem>>, vector<1x1x96xf32>
    %54 = vector.shape_cast %53 : vector<1x1x96xf32> to vector<1x96xf32>
    %c0_28 = arith.constant 0 : index
    %c1 = arith.constant 1 : index
    %c0_29 = arith.constant 0 : index
    %55 = vector.load %arg3[%c0_28, %c1, %c0_29] : memref<2x8x128xf32, #tpu.memory_space<vmem>>, vector<1x1x32xf32>
    %56 = vector.shape_cast %55 : vector<1x1x32xf32> to vector<1x32xf32>
    %c0_30 = arith.constant 0 : index
    %c2 = arith.constant 2 : index
    %c0_31 = arith.constant 0 : index
    %57 = vector.load %arg3[%c0_30, %c2, %c0_31] : memref<2x8x128xf32, #tpu.memory_space<vmem>>, vector<1x1x32xf32>
    %58 = vector.shape_cast %57 : vector<1x1x32xf32> to vector<1x32xf32>
    %c0_32 = arith.constant 0 : index
    %c3 = arith.constant 3 : index
    %c0_33 = arith.constant 0 : index
    %59 = vector.load %arg3[%c0_32, %c3, %c0_33] : memref<2x8x128xf32, #tpu.memory_space<vmem>>, vector<1x1x32xf32>
    %60 = vector.shape_cast %59 : vector<1x1x32xf32> to vector<1x32xf32>
    %c0_34 = arith.constant 0 : index
    %c4 = arith.constant 4 : index
    %c0_35 = arith.constant 0 : index
    %61 = vector.load %arg3[%c0_34, %c4, %c0_35] : memref<2x8x128xf32, #tpu.memory_space<vmem>>, vector<1x1x64xf32>
    %62 = vector.shape_cast %61 : vector<1x1x64xf32> to vector<1x64xf32>
    %c0_36 = arith.constant 0 : index
    %c5 = arith.constant 5 : index
    %c0_37 = arith.constant 0 : index
    %63 = vector.load %arg3[%c0_36, %c5, %c0_37] : memref<2x8x128xf32, #tpu.memory_space<vmem>>, vector<1x1x32xf32>
    %64 = vector.shape_cast %63 : vector<1x1x32xf32> to vector<1x32xf32>
    %c0_38 = arith.constant 0 : index
    %c6 = arith.constant 6 : index
    %c0_39 = arith.constant 0 : index
    %65 = vector.load %arg3[%c0_38, %c6, %c0_39] : memref<2x8x128xf32, #tpu.memory_space<vmem>>, vector<1x1x32xf32>
    %66 = vector.shape_cast %65 : vector<1x1x32xf32> to vector<1x32xf32>
    %c0_40 = arith.constant 0 : index
    %c7 = arith.constant 7 : index
    %c0_41 = arith.constant 0 : index
    %67 = vector.load %arg3[%c0_40, %c7, %c0_41] : memref<2x8x128xf32, #tpu.memory_space<vmem>>, vector<1x1x32xf32>
    %68 = vector.shape_cast %67 : vector<1x1x32xf32> to vector<1x32xf32>
    %cst_42 = arith.constant dense<0.000000e+00> : vector<16x96xf32>
    %69 = tpu.matmul %41, %46, %cst_42 {dimension_numbers = #tpu.dot_dimension_numbers<[1], [0], [0], [1], [0, 0, 1, 1], [], []>} : vector<16x32xf32>, vector<32x96xf32>, vector<16x96xf32> -> vector<16x96xf32>
    %70 = vector.broadcast %54 : vector<1x96xf32> to vector<16x96xf32>
    %71 = arith.addf %69, %70 : vector<16x96xf32>
    %72 = vector.extract_strided_slice %71 {offsets = [0, 0], sizes = [16, 8], strides = [1, 1]} : vector<16x96xf32> to vector<16x8xf32>
    %73 = vector.extract_strided_slice %71 {offsets = [0, 8], sizes = [16, 8], strides = [1, 1]} : vector<16x96xf32> to vector<16x8xf32>
    %74 = vector.extract_strided_slice %71 {offsets = [0, 16], sizes = [16, 8], strides = [1, 1]} : vector<16x96xf32> to vector<16x8xf32>
    %75 = vector.extract_strided_slice %71 {offsets = [0, 24], sizes = [16, 8], strides = [1, 1]} : vector<16x96xf32> to vector<16x8xf32>
    %76 = vector.shape_cast %72 : vector<16x8xf32> to vector<1x16x8xf32>
    %77 = vector.shape_cast %73 : vector<16x8xf32> to vector<1x16x8xf32>
    %78 = vector.shape_cast %74 : vector<16x8xf32> to vector<1x16x8xf32>
    %79 = vector.shape_cast %75 : vector<16x8xf32> to vector<1x16x8xf32>
    %80 = tpu.concatenate %76, %77, %78, %79 in 0 : vector<1x16x8xf32>, vector<1x16x8xf32>, vector<1x16x8xf32>, vector<1x16x8xf32> -> vector<4x16x8xf32>
    %cst_43 = arith.constant 0.353553385 : f32
    %81 = vector.broadcast %cst_43 : f32 to vector<4x16x8xf32>
    %82 = arith.mulf %80, %81 : vector<4x16x8xf32>
    %83 = vector.extract_strided_slice %71 {offsets = [0, 32], sizes = [16, 8], strides = [1, 1]} : vector<16x96xf32> to vector<16x8xf32>
    %84 = vector.extract_strided_slice %71 {offsets = [0, 40], sizes = [16, 8], strides = [1, 1]} : vector<16x96xf32> to vector<16x8xf32>
    %85 = vector.extract_strided_slice %71 {offsets = [0, 48], sizes = [16, 8], strides = [1, 1]} : vector<16x96xf32> to vector<16x8xf32>
    %86 = vector.extract_strided_slice %71 {offsets = [0, 56], sizes = [16, 8], strides = [1, 1]} : vector<16x96xf32> to vector<16x8xf32>
    %87 = vector.shape_cast %83 : vector<16x8xf32> to vector<1x16x8xf32>
    %88 = vector.shape_cast %84 : vector<16x8xf32> to vector<1x16x8xf32>
    %89 = vector.shape_cast %85 : vector<16x8xf32> to vector<1x16x8xf32>
    %90 = vector.shape_cast %86 : vector<16x8xf32> to vector<1x16x8xf32>
    %91 = tpu.concatenate %87, %88, %89, %90 in 0 : vector<1x16x8xf32>, vector<1x16x8xf32>, vector<1x16x8xf32>, vector<1x16x8xf32> -> vector<4x16x8xf32>
    %92 = vector.extract_strided_slice %71 {offsets = [0, 64], sizes = [16, 8], strides = [1, 1]} : vector<16x96xf32> to vector<16x8xf32>
    %93 = vector.extract_strided_slice %71 {offsets = [0, 72], sizes = [16, 8], strides = [1, 1]} : vector<16x96xf32> to vector<16x8xf32>
    %94 = vector.extract_strided_slice %71 {offsets = [0, 80], sizes = [16, 8], strides = [1, 1]} : vector<16x96xf32> to vector<16x8xf32>
    %95 = vector.extract_strided_slice %71 {offsets = [0, 88], sizes = [16, 8], strides = [1, 1]} : vector<16x96xf32> to vector<16x8xf32>
    %96 = vector.shape_cast %92 : vector<16x8xf32> to vector<1x16x8xf32>
    %97 = vector.shape_cast %93 : vector<16x8xf32> to vector<1x16x8xf32>
    %98 = vector.shape_cast %94 : vector<16x8xf32> to vector<1x16x8xf32>
    %99 = vector.shape_cast %95 : vector<16x8xf32> to vector<1x16x8xf32>
    %100 = tpu.concatenate %96, %97, %98, %99 in 0 : vector<1x16x8xf32>, vector<1x16x8xf32>, vector<1x16x8xf32>, vector<1x16x8xf32> -> vector<4x16x8xf32>
    "tpu.trace_start"() <{level = 10 : i32, message = "hqd,hkd->hqk"}> : () -> ()
    %cst_44 = arith.constant dense<0.000000e+00> : vector<4x16x16xf32>
    %101 = tpu.matmul %82, %91, %cst_44 {dimension_numbers = #tpu.dot_dimension_numbers<[2], [2], [1], [1], [0, 0, 0, 1, 1, 1], [0], [0]>} : vector<4x16x8xf32>, vector<4x16x8xf32>, vector<4x16x16xf32> -> vector<4x16x16xf32>
    %cst_45 = arith.constant -1.000000e+09 : f32
    "tpu.trace_stop"() : () -> ()
    %102 = vector.shape_cast %44 : vector<16x16xi1> to vector<1x16x16xi1>
    %103 = vector.broadcast %102 : vector<1x16x16xi1> to vector<4x16x16xi1>
    %104 = vector.broadcast %cst_45 : f32 to vector<4x16x16xf32>
    %105 = arith.select %103, %104, %101 : vector<4x16x16xi1>, vector<4x16x16xf32>
    %cst_46 = arith.constant dense<0xFF800000> : vector<4x16xf32>
    %106 = vector.multi_reduction <maximumf>, %105, %cst_46 [2] : vector<4x16x16xf32> to vector<4x16xf32>
    %107 = vector.shape_cast %106 : vector<4x16xf32> to vector<4x16x1xf32>
    %108 = vector.broadcast %107 : vector<4x16x1xf32> to vector<4x16x16xf32>
    %109 = arith.subf %105, %108 : vector<4x16x16xf32>
    %110 = math.exp %109 : vector<4x16x16xf32>
    %cst_47 = arith.constant dense<0.000000e+00> : vector<4x16xf32>
    %111 = vector.multi_reduction <add>, %110, %cst_47 [2] : vector<4x16x16xf32> to vector<4x16xf32>
    %112 = vector.shape_cast %111 : vector<4x16xf32> to vector<4x16x1xf32>
    %113 = tpu.reciprocal %112 {approx = true} : vector<4x16x1xf32> -> vector<4x16x1xf32>
    %114 = vector.broadcast %113 : vector<4x16x1xf32> to vector<4x16x16xf32>
    %115 = arith.mulf %110, %114 : vector<4x16x16xf32>
    "tpu.trace_start"() <{level = 10 : i32, message = "hqk,hkd->hqd"}> : () -> ()
    %cst_48 = arith.constant dense<0.000000e+00> : vector<4x16x8xf32>
    %116 = tpu.matmul %115, %100, %cst_48 {dimension_numbers = #tpu.dot_dimension_numbers<[2], [1], [1], [2], [0, 0, 0, 1, 1, 2], [0], [0]>} : vector<4x16x16xf32>, vector<4x16x8xf32>, vector<4x16x8xf32> -> vector<4x16x8xf32>
    "tpu.trace_stop"() : () -> ()
    %117 = vector.extract_strided_slice %116 {offsets = [0, 0, 0], sizes = [1, 16, 8], strides = [1, 1, 1]} : vector<4x16x8xf32> to vector<1x16x8xf32>
    %118 = vector.shape_cast %117 : vector<1x16x8xf32> to vector<16x8xf32>
    %119 = vector.extract_strided_slice %116 {offsets = [1, 0, 0], sizes = [1, 16, 8], strides = [1, 1, 1]} : vector<4x16x8xf32> to vector<1x16x8xf32>
    %120 = vector.shape_cast %119 : vector<1x16x8xf32> to vector<16x8xf32>
    %121 = vector.extract_strided_slice %116 {offsets = [2, 0, 0], sizes = [1, 16, 8], strides = [1, 1, 1]} : vector<4x16x8xf32> to vector<1x16x8xf32>
    %122 = vector.shape_cast %121 : vector<1x16x8xf32> to vector<16x8xf32>
    %123 = vector.extract_strided_slice %116 {offsets = [3, 0, 0], sizes = [1, 16, 8], strides = [1, 1, 1]} : vector<4x16x8xf32> to vector<1x16x8xf32>
    %124 = vector.shape_cast %123 : vector<1x16x8xf32> to vector<16x8xf32>
    %125 = tpu.concatenate %118, %120, %122, %124 in 1 : vector<16x8xf32>, vector<16x8xf32>, vector<16x8xf32>, vector<16x8xf32> -> vector<16x32xf32>
    %cst_49 = arith.constant dense<0.000000e+00> : vector<16x32xf32>
    %126 = tpu.matmul %125, %48, %cst_49 {dimension_numbers = #tpu.dot_dimension_numbers<[1], [0], [0], [1], [0, 0, 1, 1], [], []>} : vector<16x32xf32>, vector<32x32xf32>, vector<16x32xf32> -> vector<16x32xf32>
    %127 = vector.broadcast %56 : vector<1x32xf32> to vector<16x32xf32>
    %128 = arith.addf %126, %127 : vector<16x32xf32>
    %129 = arith.addf %41, %128 : vector<16x32xf32>
    %cst_50 = arith.constant dense<0.000000e+00> : vector<16xf32>
    %130 = vector.multi_reduction <add>, %129, %cst_50 [1] : vector<16x32xf32> to vector<16xf32>
    %131 = vector.shape_cast %130 : vector<16xf32> to vector<16x1xf32>
    %cst_51 = arith.constant 3.200000e+01 : f32
    %132 = vector.broadcast %cst_51 : f32 to vector<16x1xf32>
    %133 = arith.divf %131, %132 : vector<16x1xf32>
    %134 = vector.broadcast %133 : vector<16x1xf32> to vector<16x32xf32>
    %135 = arith.subf %129, %134 : vector<16x32xf32>
    %136 = arith.mulf %135, %135 : vector<16x32xf32>
    %cst_52 = arith.constant dense<0.000000e+00> : vector<16xf32>
    %137 = vector.multi_reduction <add>, %136, %cst_52 [1] : vector<16x32xf32> to vector<16xf32>
    %138 = vector.shape_cast %137 : vector<16xf32> to vector<16x1xf32>
    %cst_53 = arith.constant 3.200000e+01 : f32
    %139 = vector.broadcast %cst_53 : f32 to vector<16x1xf32>
    %140 = arith.divf %138, %139 : vector<16x1xf32>
    %141 = vector.broadcast %133 : vector<16x1xf32> to vector<16x32xf32>
    %142 = arith.subf %129, %141 : vector<16x32xf32>
    %cst_54 = arith.constant 9.99999974E-6 : f32
    %143 = vector.broadcast %cst_54 : f32 to vector<16x1xf32>
    %144 = arith.addf %140, %143 : vector<16x1xf32>
    %145 = math.rsqrt %144 : vector<16x1xf32>
    %146 = vector.broadcast %145 : vector<16x1xf32> to vector<16x32xf32>
    %147 = arith.mulf %142, %146 : vector<16x32xf32>
    %148 = vector.broadcast %58 : vector<1x32xf32> to vector<16x32xf32>
    %149 = arith.mulf %147, %148 : vector<16x32xf32>
    %150 = vector.broadcast %60 : vector<1x32xf32> to vector<16x32xf32>
    %151 = arith.addf %149, %150 : vector<16x32xf32>
    %cst_55 = arith.constant dense<0.000000e+00> : vector<16x64xf32>
    %152 = tpu.matmul %151, %50, %cst_55 {dimension_numbers = #tpu.dot_dimension_numbers<[1], [0], [0], [1], [0, 0, 1, 1], [], []>} : vector<16x32xf32>, vector<32x64xf32>, vector<16x64xf32> -> vector<16x64xf32>
    %153 = vector.broadcast %62 : vector<1x64xf32> to vector<16x64xf32>
    %154 = arith.addf %152, %153 : vector<16x64xf32>
    %cst_56 = arith.constant 5.000000e-01 : f32
    %155 = vector.broadcast %cst_56 : f32 to vector<16x64xf32>
    %156 = arith.mulf %155, %154 : vector<16x64xf32>
    %cst_57 = arith.constant 0.707106769 : f32
    %157 = vector.broadcast %cst_57 : f32 to vector<16x64xf32>
    %158 = arith.mulf %154, %157 : vector<16x64xf32>
    %159 = math.absf %158 : vector<16x64xf32>
    %cst_58 = arith.constant 0.327591091 : f32
    %160 = vector.broadcast %cst_58 : f32 to vector<16x64xf32>
    %161 = arith.mulf %160, %159 : vector<16x64xf32>
    %cst_59 = arith.constant 1.000000e+00 : f32
    %162 = vector.broadcast %cst_59 : f32 to vector<16x64xf32>
    %163 = arith.addf %162, %161 : vector<16x64xf32>
    %cst_60 = arith.constant 1.000000e+00 : f32
    %164 = vector.broadcast %cst_60 : f32 to vector<16x64xf32>
    %165 = arith.divf %164, %163 : vector<16x64xf32>
    %cst_61 = arith.constant 1.06140542 : f32
    %166 = vector.broadcast %cst_61 : f32 to vector<16x64xf32>
    %167 = arith.mulf %165, %166 : vector<16x64xf32>
    %cst_62 = arith.constant -1.45315206 : f32
    %168 = vector.broadcast %cst_62 : f32 to vector<16x64xf32>
    %169 = arith.addf %168, %167 : vector<16x64xf32>
    %170 = arith.mulf %165, %169 : vector<16x64xf32>
    %cst_63 = arith.constant 1.42141378 : f32
    %171 = vector.broadcast %cst_63 : f32 to vector<16x64xf32>
    %172 = arith.addf %171, %170 : vector<16x64xf32>
    %173 = arith.mulf %165, %172 : vector<16x64xf32>
    %cst_64 = arith.constant -0.284496725 : f32
    %174 = vector.broadcast %cst_64 : f32 to vector<16x64xf32>
    %175 = arith.addf %174, %173 : vector<16x64xf32>
    %176 = arith.mulf %165, %175 : vector<16x64xf32>
    %cst_65 = arith.constant 0.254829586 : f32
    %177 = vector.broadcast %cst_65 : f32 to vector<16x64xf32>
    %178 = arith.addf %177, %176 : vector<16x64xf32>
    %179 = arith.mulf %165, %178 : vector<16x64xf32>
    %cst_66 = arith.constant 0.000000e+00 : f32
    %180 = vector.broadcast %cst_66 : f32 to vector<16x64xf32>
    %181 = arith.subf %180, %159 : vector<16x64xf32>
    %182 = arith.mulf %181, %159 : vector<16x64xf32>
    %183 = math.exp %182 : vector<16x64xf32>
    %184 = arith.mulf %179, %183 : vector<16x64xf32>
    %cst_67 = arith.constant 1.000000e+00 : f32
    %185 = vector.broadcast %cst_67 : f32 to vector<16x64xf32>
    %186 = arith.subf %185, %184 : vector<16x64xf32>
    %cst_68 = arith.constant 0.000000e+00 : f32
    %187 = vector.broadcast %cst_68 : f32 to vector<16x64xf32>
    %188 = arith.cmpf oge, %158, %187 : vector<16x64xf32>
    %cst_69 = arith.constant 0.000000e+00 : f32
    %189 = vector.broadcast %cst_69 : f32 to vector<16x64xf32>
    %190 = arith.subf %189, %186 : vector<16x64xf32>
    %191 = arith.select %188, %186, %190 : vector<16x64xi1>, vector<16x64xf32>
    %cst_70 = arith.constant 1.000000e+00 : f32
    %192 = vector.broadcast %cst_70 : f32 to vector<16x64xf32>
    %193 = arith.addf %192, %191 : vector<16x64xf32>
    %194 = arith.mulf %156, %193 : vector<16x64xf32>
    %cst_71 = arith.constant dense<0.000000e+00> : vector<16x32xf32>
    %195 = tpu.matmul %194, %52, %cst_71 {dimension_numbers = #tpu.dot_dimension_numbers<[1], [0], [0], [1], [0, 0, 1, 1], [], []>} : vector<16x64xf32>, vector<64x32xf32>, vector<16x32xf32> -> vector<16x32xf32>
    %196 = vector.broadcast %64 : vector<1x32xf32> to vector<16x32xf32>
    %197 = arith.addf %195, %196 : vector<16x32xf32>
    %198 = arith.addf %151, %197 : vector<16x32xf32>
    %cst_72 = arith.constant dense<0.000000e+00> : vector<16xf32>
    %199 = vector.multi_reduction <add>, %198, %cst_72 [1] : vector<16x32xf32> to vector<16xf32>
    %200 = vector.shape_cast %199 : vector<16xf32> to vector<16x1xf32>
    %cst_73 = arith.constant 3.200000e+01 : f32
    %201 = vector.broadcast %cst_73 : f32 to vector<16x1xf32>
    %202 = arith.divf %200, %201 : vector<16x1xf32>
    %203 = vector.broadcast %202 : vector<16x1xf32> to vector<16x32xf32>
    %204 = arith.subf %198, %203 : vector<16x32xf32>
    %205 = arith.mulf %204, %204 : vector<16x32xf32>
    %cst_74 = arith.constant dense<0.000000e+00> : vector<16xf32>
    %206 = vector.multi_reduction <add>, %205, %cst_74 [1] : vector<16x32xf32> to vector<16xf32>
    %207 = vector.shape_cast %206 : vector<16xf32> to vector<16x1xf32>
    %cst_75 = arith.constant 3.200000e+01 : f32
    %208 = vector.broadcast %cst_75 : f32 to vector<16x1xf32>
    %209 = arith.divf %207, %208 : vector<16x1xf32>
    %210 = vector.broadcast %202 : vector<16x1xf32> to vector<16x32xf32>
    %211 = arith.subf %198, %210 : vector<16x32xf32>
    %cst_76 = arith.constant 9.99999974E-6 : f32
    %212 = vector.broadcast %cst_76 : f32 to vector<16x1xf32>
    %213 = arith.addf %209, %212 : vector<16x1xf32>
    %214 = math.rsqrt %213 : vector<16x1xf32>
    %215 = vector.broadcast %214 : vector<16x1xf32> to vector<16x32xf32>
    %216 = arith.mulf %211, %215 : vector<16x32xf32>
    %217 = vector.broadcast %66 : vector<1x32xf32> to vector<16x32xf32>
    %218 = arith.mulf %216, %217 : vector<16x32xf32>
    %219 = vector.broadcast %68 : vector<1x32xf32> to vector<16x32xf32>
    %220 = arith.addf %218, %219 : vector<16x32xf32>
    %c1_77 = arith.constant 1 : index
    %c0_78 = arith.constant 0 : index
    %c0_79 = arith.constant 0 : index
    %221 = vector.load %arg4[%c1_77, %c0_78, %c0_79] : memref<2x32x128xf32, #tpu.memory_space<vmem>>, vector<1x32x96xf32>
    %222 = vector.shape_cast %221 : vector<1x32x96xf32> to vector<32x96xf32>
    %c1_80 = arith.constant 1 : index
    %c0_81 = arith.constant 0 : index
    %c96_82 = arith.constant 96 : index
    %223 = vector.load %arg4[%c1_80, %c0_81, %c96_82] : memref<2x32x128xf32, #tpu.memory_space<vmem>>, vector<1x32x32xf32>
    %224 = vector.shape_cast %223 : vector<1x32x32xf32> to vector<32x32xf32>
    %c1_83 = arith.constant 1 : index
    %c0_84 = arith.constant 0 : index
    %c0_85 = arith.constant 0 : index
    %225 = vector.load %arg5[%c1_83, %c0_84, %c0_85] : memref<2x96x64xf32, #tpu.memory_space<vmem>>, vector<1x32x64xf32>
    %226 = vector.shape_cast %225 : vector<1x32x64xf32> to vector<32x64xf32>
    %c1_86 = arith.constant 1 : index
    %c32_87 = arith.constant 32 : index
    %c0_88 = arith.constant 0 : index
    %227 = vector.load %arg5[%c1_86, %c32_87, %c0_88] : memref<2x96x64xf32, #tpu.memory_space<vmem>>, vector<1x64x32xf32>
    %228 = vector.shape_cast %227 : vector<1x64x32xf32> to vector<64x32xf32>
    %c1_89 = arith.constant 1 : index
    %c0_90 = arith.constant 0 : index
    %c0_91 = arith.constant 0 : index
    %229 = vector.load %arg3[%c1_89, %c0_90, %c0_91] : memref<2x8x128xf32, #tpu.memory_space<vmem>>, vector<1x1x96xf32>
    %230 = vector.shape_cast %229 : vector<1x1x96xf32> to vector<1x96xf32>
    %c1_92 = arith.constant 1 : index
    %c1_93 = arith.constant 1 : index
    %c0_94 = arith.constant 0 : index
    %231 = vector.load %arg3[%c1_92, %c1_93, %c0_94] : memref<2x8x128xf32, #tpu.memory_space<vmem>>, vector<1x1x32xf32>
    %232 = vector.shape_cast %231 : vector<1x1x32xf32> to vector<1x32xf32>
    %c1_95 = arith.constant 1 : index
    %c2_96 = arith.constant 2 : index
    %c0_97 = arith.constant 0 : index
    %233 = vector.load %arg3[%c1_95, %c2_96, %c0_97] : memref<2x8x128xf32, #tpu.memory_space<vmem>>, vector<1x1x32xf32>
    %234 = vector.shape_cast %233 : vector<1x1x32xf32> to vector<1x32xf32>
    %c1_98 = arith.constant 1 : index
    %c3_99 = arith.constant 3 : index
    %c0_100 = arith.constant 0 : index
    %235 = vector.load %arg3[%c1_98, %c3_99, %c0_100] : memref<2x8x128xf32, #tpu.memory_space<vmem>>, vector<1x1x32xf32>
    %236 = vector.shape_cast %235 : vector<1x1x32xf32> to vector<1x32xf32>
    %c1_101 = arith.constant 1 : index
    %c4_102 = arith.constant 4 : index
    %c0_103 = arith.constant 0 : index
    %237 = vector.load %arg3[%c1_101, %c4_102, %c0_103] : memref<2x8x128xf32, #tpu.memory_space<vmem>>, vector<1x1x64xf32>
    %238 = vector.shape_cast %237 : vector<1x1x64xf32> to vector<1x64xf32>
    %c1_104 = arith.constant 1 : index
    %c5_105 = arith.constant 5 : index
    %c0_106 = arith.constant 0 : index
    %239 = vector.load %arg3[%c1_104, %c5_105, %c0_106] : memref<2x8x128xf32, #tpu.memory_space<vmem>>, vector<1x1x32xf32>
    %240 = vector.shape_cast %239 : vector<1x1x32xf32> to vector<1x32xf32>
    %c1_107 = arith.constant 1 : index
    %c6_108 = arith.constant 6 : index
    %c0_109 = arith.constant 0 : index
    %241 = vector.load %arg3[%c1_107, %c6_108, %c0_109] : memref<2x8x128xf32, #tpu.memory_space<vmem>>, vector<1x1x32xf32>
    %242 = vector.shape_cast %241 : vector<1x1x32xf32> to vector<1x32xf32>
    %c1_110 = arith.constant 1 : index
    %c7_111 = arith.constant 7 : index
    %c0_112 = arith.constant 0 : index
    %243 = vector.load %arg3[%c1_110, %c7_111, %c0_112] : memref<2x8x128xf32, #tpu.memory_space<vmem>>, vector<1x1x32xf32>
    %244 = vector.shape_cast %243 : vector<1x1x32xf32> to vector<1x32xf32>
    %cst_113 = arith.constant dense<0.000000e+00> : vector<16x96xf32>
    %245 = tpu.matmul %220, %222, %cst_113 {dimension_numbers = #tpu.dot_dimension_numbers<[1], [0], [0], [1], [0, 0, 1, 1], [], []>} : vector<16x32xf32>, vector<32x96xf32>, vector<16x96xf32> -> vector<16x96xf32>
    %246 = vector.broadcast %230 : vector<1x96xf32> to vector<16x96xf32>
    %247 = arith.addf %245, %246 : vector<16x96xf32>
    %248 = vector.extract_strided_slice %247 {offsets = [0, 0], sizes = [16, 8], strides = [1, 1]} : vector<16x96xf32> to vector<16x8xf32>
    %249 = vector.extract_strided_slice %247 {offsets = [0, 8], sizes = [16, 8], strides = [1, 1]} : vector<16x96xf32> to vector<16x8xf32>
    %250 = vector.extract_strided_slice %247 {offsets = [0, 16], sizes = [16, 8], strides = [1, 1]} : vector<16x96xf32> to vector<16x8xf32>
    %251 = vector.extract_strided_slice %247 {offsets = [0, 24], sizes = [16, 8], strides = [1, 1]} : vector<16x96xf32> to vector<16x8xf32>
    %252 = vector.shape_cast %248 : vector<16x8xf32> to vector<1x16x8xf32>
    %253 = vector.shape_cast %249 : vector<16x8xf32> to vector<1x16x8xf32>
    %254 = vector.shape_cast %250 : vector<16x8xf32> to vector<1x16x8xf32>
    %255 = vector.shape_cast %251 : vector<16x8xf32> to vector<1x16x8xf32>
    %256 = tpu.concatenate %252, %253, %254, %255 in 0 : vector<1x16x8xf32>, vector<1x16x8xf32>, vector<1x16x8xf32>, vector<1x16x8xf32> -> vector<4x16x8xf32>
    %cst_114 = arith.constant 0.353553385 : f32
    %257 = vector.broadcast %cst_114 : f32 to vector<4x16x8xf32>
    %258 = arith.mulf %256, %257 : vector<4x16x8xf32>
    %259 = vector.extract_strided_slice %247 {offsets = [0, 32], sizes = [16, 8], strides = [1, 1]} : vector<16x96xf32> to vector<16x8xf32>
    %260 = vector.extract_strided_slice %247 {offsets = [0, 40], sizes = [16, 8], strides = [1, 1]} : vector<16x96xf32> to vector<16x8xf32>
    %261 = vector.extract_strided_slice %247 {offsets = [0, 48], sizes = [16, 8], strides = [1, 1]} : vector<16x96xf32> to vector<16x8xf32>
    %262 = vector.extract_strided_slice %247 {offsets = [0, 56], sizes = [16, 8], strides = [1, 1]} : vector<16x96xf32> to vector<16x8xf32>
    %263 = vector.shape_cast %259 : vector<16x8xf32> to vector<1x16x8xf32>
    %264 = vector.shape_cast %260 : vector<16x8xf32> to vector<1x16x8xf32>
    %265 = vector.shape_cast %261 : vector<16x8xf32> to vector<1x16x8xf32>
    %266 = vector.shape_cast %262 : vector<16x8xf32> to vector<1x16x8xf32>
    %267 = tpu.concatenate %263, %264, %265, %266 in 0 : vector<1x16x8xf32>, vector<1x16x8xf32>, vector<1x16x8xf32>, vector<1x16x8xf32> -> vector<4x16x8xf32>
    %268 = vector.extract_strided_slice %247 {offsets = [0, 64], sizes = [16, 8], strides = [1, 1]} : vector<16x96xf32> to vector<16x8xf32>
    %269 = vector.extract_strided_slice %247 {offsets = [0, 72], sizes = [16, 8], strides = [1, 1]} : vector<16x96xf32> to vector<16x8xf32>
    %270 = vector.extract_strided_slice %247 {offsets = [0, 80], sizes = [16, 8], strides = [1, 1]} : vector<16x96xf32> to vector<16x8xf32>
    %271 = vector.extract_strided_slice %247 {offsets = [0, 88], sizes = [16, 8], strides = [1, 1]} : vector<16x96xf32> to vector<16x8xf32>
    %272 = vector.shape_cast %268 : vector<16x8xf32> to vector<1x16x8xf32>
    %273 = vector.shape_cast %269 : vector<16x8xf32> to vector<1x16x8xf32>
    %274 = vector.shape_cast %270 : vector<16x8xf32> to vector<1x16x8xf32>
    %275 = vector.shape_cast %271 : vector<16x8xf32> to vector<1x16x8xf32>
    %276 = tpu.concatenate %272, %273, %274, %275 in 0 : vector<1x16x8xf32>, vector<1x16x8xf32>, vector<1x16x8xf32>, vector<1x16x8xf32> -> vector<4x16x8xf32>
    "tpu.trace_start"() <{level = 10 : i32, message = "hqd,hkd->hqk"}> : () -> ()
    %cst_115 = arith.constant dense<0.000000e+00> : vector<4x16x16xf32>
    %277 = tpu.matmul %258, %267, %cst_115 {dimension_numbers = #tpu.dot_dimension_numbers<[2], [2], [1], [1], [0, 0, 0, 1, 1, 1], [0], [0]>} : vector<4x16x8xf32>, vector<4x16x8xf32>, vector<4x16x16xf32> -> vector<4x16x16xf32>
    %cst_116 = arith.constant -1.000000e+09 : f32
    "tpu.trace_stop"() : () -> ()
    %278 = vector.shape_cast %44 : vector<16x16xi1> to vector<1x16x16xi1>
    %279 = vector.broadcast %278 : vector<1x16x16xi1> to vector<4x16x16xi1>
    %280 = vector.broadcast %cst_116 : f32 to vector<4x16x16xf32>
    %281 = arith.select %279, %280, %277 : vector<4x16x16xi1>, vector<4x16x16xf32>
    %cst_117 = arith.constant dense<0xFF800000> : vector<4x16xf32>
    %282 = vector.multi_reduction <maximumf>, %281, %cst_117 [2] : vector<4x16x16xf32> to vector<4x16xf32>
    %283 = vector.shape_cast %282 : vector<4x16xf32> to vector<4x16x1xf32>
    %284 = vector.broadcast %283 : vector<4x16x1xf32> to vector<4x16x16xf32>
    %285 = arith.subf %281, %284 : vector<4x16x16xf32>
    %286 = math.exp %285 : vector<4x16x16xf32>
    %cst_118 = arith.constant dense<0.000000e+00> : vector<4x16xf32>
    %287 = vector.multi_reduction <add>, %286, %cst_118 [2] : vector<4x16x16xf32> to vector<4x16xf32>
    %288 = vector.shape_cast %287 : vector<4x16xf32> to vector<4x16x1xf32>
    %289 = tpu.reciprocal %288 {approx = true} : vector<4x16x1xf32> -> vector<4x16x1xf32>
    %290 = vector.broadcast %289 : vector<4x16x1xf32> to vector<4x16x16xf32>
    %291 = arith.mulf %286, %290 : vector<4x16x16xf32>
    "tpu.trace_start"() <{level = 10 : i32, message = "hqk,hkd->hqd"}> : () -> ()
    %cst_119 = arith.constant dense<0.000000e+00> : vector<4x16x8xf32>
    %292 = tpu.matmul %291, %276, %cst_119 {dimension_numbers = #tpu.dot_dimension_numbers<[2], [1], [1], [2], [0, 0, 0, 1, 1, 2], [0], [0]>} : vector<4x16x16xf32>, vector<4x16x8xf32>, vector<4x16x8xf32> -> vector<4x16x8xf32>
    "tpu.trace_stop"() : () -> ()
    %293 = vector.extract_strided_slice %292 {offsets = [0, 0, 0], sizes = [1, 16, 8], strides = [1, 1, 1]} : vector<4x16x8xf32> to vector<1x16x8xf32>
    %294 = vector.shape_cast %293 : vector<1x16x8xf32> to vector<16x8xf32>
    %295 = vector.extract_strided_slice %292 {offsets = [1, 0, 0], sizes = [1, 16, 8], strides = [1, 1, 1]} : vector<4x16x8xf32> to vector<1x16x8xf32>
    %296 = vector.shape_cast %295 : vector<1x16x8xf32> to vector<16x8xf32>
    %297 = vector.extract_strided_slice %292 {offsets = [2, 0, 0], sizes = [1, 16, 8], strides = [1, 1, 1]} : vector<4x16x8xf32> to vector<1x16x8xf32>
    %298 = vector.shape_cast %297 : vector<1x16x8xf32> to vector<16x8xf32>
    %299 = vector.extract_strided_slice %292 {offsets = [3, 0, 0], sizes = [1, 16, 8], strides = [1, 1, 1]} : vector<4x16x8xf32> to vector<1x16x8xf32>
    %300 = vector.shape_cast %299 : vector<1x16x8xf32> to vector<16x8xf32>
    %301 = tpu.concatenate %294, %296, %298, %300 in 1 : vector<16x8xf32>, vector<16x8xf32>, vector<16x8xf32>, vector<16x8xf32> -> vector<16x32xf32>
    %cst_120 = arith.constant dense<0.000000e+00> : vector<16x32xf32>
    %302 = tpu.matmul %301, %224, %cst_120 {dimension_numbers = #tpu.dot_dimension_numbers<[1], [0], [0], [1], [0, 0, 1, 1], [], []>} : vector<16x32xf32>, vector<32x32xf32>, vector<16x32xf32> -> vector<16x32xf32>
    %303 = vector.broadcast %232 : vector<1x32xf32> to vector<16x32xf32>
    %304 = arith.addf %302, %303 : vector<16x32xf32>
    %305 = arith.addf %220, %304 : vector<16x32xf32>
    %cst_121 = arith.constant dense<0.000000e+00> : vector<16xf32>
    %306 = vector.multi_reduction <add>, %305, %cst_121 [1] : vector<16x32xf32> to vector<16xf32>
    %307 = vector.shape_cast %306 : vector<16xf32> to vector<16x1xf32>
    %cst_122 = arith.constant 3.200000e+01 : f32
    %308 = vector.broadcast %cst_122 : f32 to vector<16x1xf32>
    %309 = arith.divf %307, %308 : vector<16x1xf32>
    %310 = vector.broadcast %309 : vector<16x1xf32> to vector<16x32xf32>
    %311 = arith.subf %305, %310 : vector<16x32xf32>
    %312 = arith.mulf %311, %311 : vector<16x32xf32>
    %cst_123 = arith.constant dense<0.000000e+00> : vector<16xf32>
    %313 = vector.multi_reduction <add>, %312, %cst_123 [1] : vector<16x32xf32> to vector<16xf32>
    %314 = vector.shape_cast %313 : vector<16xf32> to vector<16x1xf32>
    %cst_124 = arith.constant 3.200000e+01 : f32
    %315 = vector.broadcast %cst_124 : f32 to vector<16x1xf32>
    %316 = arith.divf %314, %315 : vector<16x1xf32>
    %317 = vector.broadcast %309 : vector<16x1xf32> to vector<16x32xf32>
    %318 = arith.subf %305, %317 : vector<16x32xf32>
    %cst_125 = arith.constant 9.99999974E-6 : f32
    %319 = vector.broadcast %cst_125 : f32 to vector<16x1xf32>
    %320 = arith.addf %316, %319 : vector<16x1xf32>
    %321 = math.rsqrt %320 : vector<16x1xf32>
    %322 = vector.broadcast %321 : vector<16x1xf32> to vector<16x32xf32>
    %323 = arith.mulf %318, %322 : vector<16x32xf32>
    %324 = vector.broadcast %234 : vector<1x32xf32> to vector<16x32xf32>
    %325 = arith.mulf %323, %324 : vector<16x32xf32>
    %326 = vector.broadcast %236 : vector<1x32xf32> to vector<16x32xf32>
    %327 = arith.addf %325, %326 : vector<16x32xf32>
    %cst_126 = arith.constant dense<0.000000e+00> : vector<16x64xf32>
    %328 = tpu.matmul %327, %226, %cst_126 {dimension_numbers = #tpu.dot_dimension_numbers<[1], [0], [0], [1], [0, 0, 1, 1], [], []>} : vector<16x32xf32>, vector<32x64xf32>, vector<16x64xf32> -> vector<16x64xf32>
    %329 = vector.broadcast %238 : vector<1x64xf32> to vector<16x64xf32>
    %330 = arith.addf %328, %329 : vector<16x64xf32>
    %cst_127 = arith.constant 5.000000e-01 : f32
    %331 = vector.broadcast %cst_127 : f32 to vector<16x64xf32>
    %332 = arith.mulf %331, %330 : vector<16x64xf32>
    %cst_128 = arith.constant 0.707106769 : f32
    %333 = vector.broadcast %cst_128 : f32 to vector<16x64xf32>
    %334 = arith.mulf %330, %333 : vector<16x64xf32>
    %335 = math.absf %334 : vector<16x64xf32>
    %cst_129 = arith.constant 0.327591091 : f32
    %336 = vector.broadcast %cst_129 : f32 to vector<16x64xf32>
    %337 = arith.mulf %336, %335 : vector<16x64xf32>
    %cst_130 = arith.constant 1.000000e+00 : f32
    %338 = vector.broadcast %cst_130 : f32 to vector<16x64xf32>
    %339 = arith.addf %338, %337 : vector<16x64xf32>
    %cst_131 = arith.constant 1.000000e+00 : f32
    %340 = vector.broadcast %cst_131 : f32 to vector<16x64xf32>
    %341 = arith.divf %340, %339 : vector<16x64xf32>
    %cst_132 = arith.constant 1.06140542 : f32
    %342 = vector.broadcast %cst_132 : f32 to vector<16x64xf32>
    %343 = arith.mulf %341, %342 : vector<16x64xf32>
    %cst_133 = arith.constant -1.45315206 : f32
    %344 = vector.broadcast %cst_133 : f32 to vector<16x64xf32>
    %345 = arith.addf %344, %343 : vector<16x64xf32>
    %346 = arith.mulf %341, %345 : vector<16x64xf32>
    %cst_134 = arith.constant 1.42141378 : f32
    %347 = vector.broadcast %cst_134 : f32 to vector<16x64xf32>
    %348 = arith.addf %347, %346 : vector<16x64xf32>
    %349 = arith.mulf %341, %348 : vector<16x64xf32>
    %cst_135 = arith.constant -0.284496725 : f32
    %350 = vector.broadcast %cst_135 : f32 to vector<16x64xf32>
    %351 = arith.addf %350, %349 : vector<16x64xf32>
    %352 = arith.mulf %341, %351 : vector<16x64xf32>
    %cst_136 = arith.constant 0.254829586 : f32
    %353 = vector.broadcast %cst_136 : f32 to vector<16x64xf32>
    %354 = arith.addf %353, %352 : vector<16x64xf32>
    %355 = arith.mulf %341, %354 : vector<16x64xf32>
    %cst_137 = arith.constant 0.000000e+00 : f32
    %356 = vector.broadcast %cst_137 : f32 to vector<16x64xf32>
    %357 = arith.subf %356, %335 : vector<16x64xf32>
    %358 = arith.mulf %357, %335 : vector<16x64xf32>
    %359 = math.exp %358 : vector<16x64xf32>
    %360 = arith.mulf %355, %359 : vector<16x64xf32>
    %cst_138 = arith.constant 1.000000e+00 : f32
    %361 = vector.broadcast %cst_138 : f32 to vector<16x64xf32>
    %362 = arith.subf %361, %360 : vector<16x64xf32>
    %cst_139 = arith.constant 0.000000e+00 : f32
    %363 = vector.broadcast %cst_139 : f32 to vector<16x64xf32>
    %364 = arith.cmpf oge, %334, %363 : vector<16x64xf32>
    %cst_140 = arith.constant 0.000000e+00 : f32
    %365 = vector.broadcast %cst_140 : f32 to vector<16x64xf32>
    %366 = arith.subf %365, %362 : vector<16x64xf32>
    %367 = arith.select %364, %362, %366 : vector<16x64xi1>, vector<16x64xf32>
    %cst_141 = arith.constant 1.000000e+00 : f32
    %368 = vector.broadcast %cst_141 : f32 to vector<16x64xf32>
    %369 = arith.addf %368, %367 : vector<16x64xf32>
    %370 = arith.mulf %332, %369 : vector<16x64xf32>
    %cst_142 = arith.constant dense<0.000000e+00> : vector<16x32xf32>
    %371 = tpu.matmul %370, %228, %cst_142 {dimension_numbers = #tpu.dot_dimension_numbers<[1], [0], [0], [1], [0, 0, 1, 1], [], []>} : vector<16x64xf32>, vector<64x32xf32>, vector<16x32xf32> -> vector<16x32xf32>
    %372 = vector.broadcast %240 : vector<1x32xf32> to vector<16x32xf32>
    %373 = arith.addf %371, %372 : vector<16x32xf32>
    %374 = arith.addf %327, %373 : vector<16x32xf32>
    %cst_143 = arith.constant dense<0.000000e+00> : vector<16xf32>
    %375 = vector.multi_reduction <add>, %374, %cst_143 [1] : vector<16x32xf32> to vector<16xf32>
    %376 = vector.shape_cast %375 : vector<16xf32> to vector<16x1xf32>
    %cst_144 = arith.constant 3.200000e+01 : f32
    %377 = vector.broadcast %cst_144 : f32 to vector<16x1xf32>
    %378 = arith.divf %376, %377 : vector<16x1xf32>
    %379 = vector.broadcast %378 : vector<16x1xf32> to vector<16x32xf32>
    %380 = arith.subf %374, %379 : vector<16x32xf32>
    %381 = arith.mulf %380, %380 : vector<16x32xf32>
    %cst_145 = arith.constant dense<0.000000e+00> : vector<16xf32>
    %382 = vector.multi_reduction <add>, %381, %cst_145 [1] : vector<16x32xf32> to vector<16xf32>
    %383 = vector.shape_cast %382 : vector<16xf32> to vector<16x1xf32>
    %cst_146 = arith.constant 3.200000e+01 : f32
    %384 = vector.broadcast %cst_146 : f32 to vector<16x1xf32>
    %385 = arith.divf %383, %384 : vector<16x1xf32>
    %386 = vector.broadcast %378 : vector<16x1xf32> to vector<16x32xf32>
    %387 = arith.subf %374, %386 : vector<16x32xf32>
    %cst_147 = arith.constant 9.99999974E-6 : f32
    %388 = vector.broadcast %cst_147 : f32 to vector<16x1xf32>
    %389 = arith.addf %385, %388 : vector<16x1xf32>
    %390 = math.rsqrt %389 : vector<16x1xf32>
    %391 = vector.broadcast %390 : vector<16x1xf32> to vector<16x32xf32>
    %392 = arith.mulf %387, %391 : vector<16x32xf32>
    %393 = vector.broadcast %242 : vector<1x32xf32> to vector<16x32xf32>
    %394 = arith.mulf %392, %393 : vector<16x32xf32>
    %395 = vector.broadcast %244 : vector<1x32xf32> to vector<16x32xf32>
    %396 = arith.addf %394, %395 : vector<16x32xf32>
    %c0_148 = arith.constant 0 : index
    %c0_149 = arith.constant 0 : index
    %397 = vector.load %arg6[%c0_148, %c0_149] : memref<16x32xf32, #tpu.memory_space<vmem>>, vector<16x32xf32>
    tpu.vector_store %arg6[%c0_148, %c0_149], %396 {strides = array<i32>} : memref<16x32xf32, #tpu.memory_space<vmem>>, vector<16x32xf32>,
    return
  }
}

</mosaic_0001>

<bundles_post_ra>
// kernel: ne.8
= control target key start
LH: loop header
LB: loop body
LE: loop exit
PB: predicated region body
PF: predicated region fallthrough
CT: control target
= control target key end

     0   :  { %vm7_vm0 = vcmask 64512   ;;  %vm13_vm1 = vcmask 130112   ;;  %s39_s0 = inlined_call_operand.vmem [shape: s32[2,8], index: 0, kind: input, shape index: {}]   ;;  %s40_s1 = inlined_call_operand.vmem [shape: s32[16], index: 1, kind: output, shape index: {}]  }
   0x1   :  { %v4_v0 = vld [vmem:[%s39_s0] sm:$0x3]  ;;  %s22_s0 = smov 8  }
   0x2   :  { %5 = vst [vmem:[#allocation1] sm:$0x3] %v4_v0 }
   0x9   :  { %v10_v1 = vld [vmem:[#allocation1 + $0x1] sm:$0x1]   ;;  %v6_v2 = vld [vmem:[#allocation1] sm:$0x1]  }
   0xa   :  { %11 = vrot.lane.b32.xlu0 %v10_v1, %s22_s0  ;;  %8 = vst.msk [vmem:[#allocation0] sm:$0x1] %vm7_vm0, %v6_v2  }
  0x7c   :  { %v12_v3 = vpop.permute.xlu0 %11  }
  0x7d   :  { %14 = vst.msk [vmem:[#allocation0] sm:$0x1] %vm13_vm1, %v12_v3  }
  0x84   :  { %v18_v4 = vld [vmem:[#allocation0] sm:$0x1] }
  0x85   :  { %20 = vst [vmem:[%s40_s1] sm:$0x1] %v18_v4 }

// kernel: bert_forward.1
= control target key start
LH: loop header
LB: loop body
LE: loop exit
PB: predicated region body
PF: predicated region fallthrough
CT: control target
= control target key end

     0   :  { %v3860_v3 = vmov 0   ;;  %s4480_s0 = inlined_call_operand.vmem [shape: s32[16,3], index: 0, kind: input, shape index: {}]   ;;  %s4481_s1 = inlined_call_operand.vmem [shape: f32[16,16], index: 1, kind: input, shape index: {}]   ;;  %s4482_s2 = inlined_call_operand.vmem [shape: f32[64,32], index: 2, kind: input, shape index: {}]   ;;  %s4483_s3 = inlined_call_operand.vmem [shape: f32[2,8,128], index: 3, kind: input, shape index: {}]   ;;  %s4484_s4 = inlined_call_operand.vmem [shape: f32[2,32,128], index: 4, kind: input, shape index: {}]   ;;  %s4485_s5 = inlined_call_operand.vmem [shape: f32[2,96,64], index: 5, kind: input, shape index: {}]   ;;  %s4486_s6 = inlined_call_operand.hbm [shape: f32[16,32], index: 6, kind: output, shape index: {}]  }
   0x1   :  { %v25_v0 = vld [vmem:[%s4480_s0 + $0x8] sm:$0xff]  ;;  %v24_v1 = vld [vmem:[%s4480_s0] sm:$0xff]  ;;  %3632 = vset.pattern.permute.xlu1 %v3860_v3  ;;  %3630 = vset.pattern.permute.xlu0 %v3860_v3  ;;  %v60_v5 = vld [vmem:[%s4482_s2 + $0x10] sm:$0xff] }
   0x2   :  { %v58_v2 = vld [vmem:[%s4482_s2] sm:$0xff]  ;;  %v59_v4 = vld [vmem:[%s4482_s2 + $0x8] sm:$0xff]  ;;  %v61_v6 = vld [vmem:[%s4482_s2 + $0x18] sm:$0xff]  ;;  %32 = vperm.xlu1 %3632, %v25_v0   ;;  %29 = vperm.xlu0 %3630, %v24_v1  }
   0x3   :  { %v3439_v7 = vpack.c.bf16 %v59_v4, %v58_v2 }
   0x4   :  { %11 = vsyncpa [#allocation3], 0  ;;  %v3443_v8 = vpack.c.bf16 %v61_v6, %v60_v5  ;;  %v62_v9 = vld [vmem:[%s4482_s2 + $0x20] sm:$0xff]  ;;  %v63_v10 = vld [vmem:[%s4482_s2 + $0x28] sm:$0xff]  ;;  %v3861_v11 = vmov 1   ;;  %v3862_v16 = vmov 2   ;;  %v26_v19 = vlaneseq }
   0x5   :  { %3440 = vmatprep.subr.bf16.mxu0 %v3439_v7  ;;  %v3447_v12 = vpack.c.bf16 %v63_v10, %v62_v9  ;;  %v64_v13 = vld [vmem:[%s4482_s2 + $0x30] sm:$0xff]  ;;  %v65_v14 = vld [vmem:[%s4482_s2 + $0x38] sm:$0xff]  ;;  %vm66_vm9 = vcmask 523264   ;;  %v3863_v25 = vmov 0.0   ;;  %vm150_vm11 = vcmask 261120   ;;  %v3949_v42 = vld [vmem:[%s4484_s4] sm:$0xff] }
   0x6   :  { %3442 = vmatpush3.bf16.msra.mxu0 %v3439_v7  ;;  %3633 = vset.pattern.permute.xlu1 %v3861_v11  ;;  %v3451_v15 = vpack.c.bf16 %v65_v14, %v64_v13  ;;  %v27_v20 = vand.u32 127, %v26_v19  ;;  %v3954_v43 = vld [vmem:[%s4484_s4 + $0x8] sm:$0xff]  ;;  %v3959_v44 = vld [vmem:[%s4484_s4 + $0x10] sm:$0xff]  ;;  %v3968_v47 = vld [vmem:[%s4484_s4 + $0x18] sm:$0xff]  ;;  %vm335_vm12 = vcmask 64512   ;;  %s3865_s30 = smov 104  }
   0x7   :  { %3631 = vset.pattern.permute.xlu0 %v3861_v11  ;;  %40 = vperm.xlu1 %3633, %v25_v0   ;;  %v3676_v45 = vpack.i.bf16 %v3954_v43, %v3949_v42  ;;  %v3455_v46 = vpack.c.bf16 %v3954_v43, %v3949_v42  ;;  %v3459_v48 = vpack.c.bf16 %v3968_v47, %v3959_v44  ;;  %v2968_v56 = vld [vmem:[%s4482_s2 + $0x3c] ss:$0 sm:$0xff]  ;;  %v2969_v60 = vld [vmem:[%s4482_s2 + $0x3d] ss:$0 sm:$0xff]  ;;  %s3864_s2 = smov 120   ;;  %s3866_s7 = smov 112   ;;  %vm4009_vm13 = vmpackc.low %vm335_vm12, %vm335_vm12 }
   0x8   :  { %37 = vperm.xlu0 %3631, %v24_v1   ;;  %3444 = vmatprep.subr.bf16.mxu0 %v3443_v8  ;;  %s3867_s8 = smov 96   ;;  %s3869_s12 = smov 32  }
   0x9   :  { %3456 = vmatprep.subr.bf16.mxu1 %v3455_v46  ;;  %s3870_s13 = smov 8   ;;  %s3871_s14 = smov 16  }
   0xa   :  { %3446 = vmatpush3.bf16.msra.mxu0 %v3443_v8  ;;  %3458 = vmatpush3.bf16.msra.mxu1 %v3455_v46  ;;  %v4049_v46 = vld [vmem:[%s4481_s1] sm:$0xff]  ;;  %s3872_s15 = smov 24   ;;  %s3873_s29 = smov [#allocation2]  }
   0xb   :  { %3448 = vmatprep.subr.bf16.mxu0 %v3447_v12  ;;  %3634 = vset.pattern.permute.xlu1 %v3862_v16  ;;  %vm192_vm15 = vcmp.gt.f32.partialorder %v4049_v46, 0.5  ;;  %s2955_s0 = sshll.u32 %s3873_s29, 4  ;;  %s2956_s0 = int_to_ptr.vmem [resolvable:$true] %s2955_s0 }
   0xc   :  { %3635 = vset.pattern.permute.xlu0 %v3862_v16  ;;  %47 = vperm.xlu1 %3634, %v24_v1   ;;  %v2970_v1 = vld [vmem:[%s4483_s3] ss:$0 sm:$0xff]  ;;  %s3836_s9 = scalar_lea.vmem %s2956_s0, 256  ;;  %p3841_p1 = scmp.lt.s32.totalorder %s2956_s0, %s2956_s0 }
   0xd   :  { %50 = vperm.xlu0 %3635, %v25_v0   ;;  %3460 = vmatprep.subr.bf16.mxu1 %v3459_v48  ;;  %p3837_p0 = scmp.ne.s32.totalorder %s2956_s0, %s3836_s9  ;;  %p3842_p2 = scmp.lt.s32.totalorder %s3836_s9, %s3836_s9 }
   0xe   :  { %3450 = vmatpush3.bf16.msra.mxu0 %v3447_v12  ;;  %3462 = vmatpush3.bf16.msra.mxu1 %v3459_v48 }
   0xf   :  { %3452 = vmatprep.subr.bf16.mxu0 %v3451_v15  ;;  %p3843_p3 = por %p3842_p2, %p3841_p1 }
  0x11   :  { %p3844_p4 = pnand %p3843_p3, %p3837_p0 }
  0x12   :  { %3454 = vmatpush3.bf16.msra.mxu0 %v3451_v15 }
  0x81   :  { %v33_v17 = vpop.permute.xlu1 %32  ;;  %v30_v18 = vpop.permute.xlu0 %29 }
  0x82   :  { %vm35_vm2 = vcmp.eq.s32.totalorder %v27_v20, %v33_v17  ;;  %vm34_vm3 = vcmp.eq.s32.totalorder %v27_v20, %v30_v18 }
  0x86   :  { %v41_v21 = vpop.permute.xlu1 %40 }
  0x87   :  { %v38_v22 = vpop.permute.xlu0 %37  ;;  %vm43_vm0 = vcmp.eq.s32.totalorder %v27_v20, %v41_v21 }
  0x88   :  { %vm42_vm1 = vcmp.eq.s32.totalorder %v27_v20, %v38_v22  ;;  %vm45_vm4 = vmor %vm35_vm2, %vm43_vm0  ;;  %vm700_vm0 = vcmask 130048  }
  0x89   :  { %vm44_vm7 = vmor %vm34_vm3, %vm42_vm1  ;;  %vm1165_vm1 = vcmask 195584  }
  0x8b   :  { %v48_v23 = vpop.permute.xlu1 %47 }
  0x8c   :  { %v51_v24 = vpop.permute.xlu0 %50  ;;  %vm52_vm5 = vcmp.eq.s32.totalorder %v27_v20, %v48_v23 }
  0x8d   :  { %vm53_vm6 = vcmp.eq.s32.totalorder %v27_v20, %v51_v24  ;;  %vm54_vm10 = vmor %vm44_vm7, %vm52_vm5 }
  0x8e   :  { %vm55_vm8 = vmor %vm45_vm4, %vm53_vm6  ;;  %v56_v27 = vsel %vm54_vm10, 1.0, %v3863_v25 }
  0x8f   :  { %v57_v26 = vsel %vm55_vm8, 1.0, %v3863_v25  ;;  %3220 = vmatprep.mubr.msk.f32.mxu0 %vm66_vm9, %v56_v27 }
  0x90   :  { %3221 = vmatmul.mubr.msk.f32.vlgmr.msra.gmra.mrb[0].mxu0 %vm66_vm9, %v57_v26 }
 0x163   :  { %v3222_v28 = vpop.f32.mrb[0].mxu0 }
 0x164   :  { %v139_v29 = vpop.f32.mrb[1].mxu0  ;;  %v154_v30 = vsel %vm150_vm11, %v3222_v28, 0.0 }
 0x165   :  { %155 = vadd.xlane.f32.xlu0 %v154_v30  ;;  %v151_v31 = vsel %vm150_vm11, %v139_v29, 0.0 }
 0x166   :  { %152 = vadd.xlane.f32.xlu1 %v151_v31 }
 0x1f2   :  { %v156_v32 = vpop.xlane.xlu0 %155 }
 0x1f3   :  { %v159_v33 = vmul.f32 0.03125, %v156_v32  ;;  %v153_v34 = vpop.xlane.xlu1 %152 }
 0x1f4   :  { %v158_v35 = vmul.f32 0.03125, %v153_v34 }
 0x1f5   :  { %v161_v36 = vsub.f32 %v3222_v28, %v159_v33 }
 0x1f6   :  { %v160_v37 = vsub.f32 %v139_v29, %v158_v35 }
 0x1f7   :  { %v163_v38 = vmul.f32 %v161_v36, %v161_v36 }
 0x1f8   :  { %v162_v39 = vmul.f32 %v160_v37, %v160_v37 }
 0x1f9   :  { %v167_v40 = vsel %vm150_vm11, %v163_v38, 0.0 }
 0x1fa   :  { %168 = vadd.xlane.f32.xlu0 %v167_v40  ;;  %v164_v41 = vsel %vm150_vm11, %v162_v39, 0.0 }
 0x1fb   :  { %165 = vadd.xlane.f32.xlu1 %v164_v41  ;;  %v4044_v41 = vld [vmem:[%s4481_s1 + $0x8] sm:$0xff]  ;;  %s3868_s1 = smov 64  }
 0x1fc   :  { %vm193_vm14 = vcmp.gt.f32.partialorder %v4044_v41, 0.5 }
 0x287   :  { %v169_v49 = vpop.xlane.xlu0 %168 }
 0x288   :  { %v171_v50 = vmul.f32 0.03125, %v169_v49  ;;  %v166_v51 = vpop.xlane.xlu1 %165 }
 0x289   :  { %v170_v52 = vmul.f32 0.03125, %v166_v51 }
 0x28a   :  { %v173_v53 = vadd.f32 1e-05, %v171_v50 }
 0x28b   :  { %v172_v54 = vadd.f32 1e-05, %v170_v52 }
 0x28c   :  { %3736 = vrsqrt.f32 %v173_v53 }
 0x28d   :  { %3738 = vrsqrt.f32 %v172_v54 }
 0x296   :  { %v3737_v55 = vpop.eup %3736 }
 0x297   :  { %v3739_v57 = vpop.eup %3738  ;;  %v177_v58 = vmul.f32 %v3737_v55, %v161_v36 }
 0x298   :  { %v176_v59 = vmul.f32 %v3739_v57, %v160_v37 }
 0x299   :  { %v183_v61 = vmul.f32 %v2968_v56, %v177_v58 }
 0x29a   :  { %v182_v62 = vmul.f32 %v2968_v56, %v176_v59 }
 0x29b   :  { %v3980_v0 = vadd.f32 %v2969_v60, %v183_v61 }
 0x29c   :  { %v3978_v63 = vadd.f32 %v2969_v60, %v182_v62 }
 0x29e   :  { %3231 = vmatprep.mubr.msk.f32.mxu1 %vm150_vm11, %v3978_v63 }
 0x29f   :  { %3232 = vmatmul.mubr.msk.f32.vlgmr.msra.gmra.mrb[0].mxu1 %vm150_vm11, %v3980_v0 }
 0x372   :  { %v3233_v2 = vpop.f32.mrb[0].mxu1 }
 0x373   :  { %v300_v3 = vadd.f32 %v3233_v2, %v2970_v1  ;;  %v294_v4 = vpop.f32.mrb[1].mxu1 }
 0x374   :  { %v295_v5 = vadd.f32 %v2970_v1, %v294_v4 }
 0x375   :  { %307 = vrot.lane.b32.xlu0 %v300_v3, %s3864_s2  ;;  %v324_v23 = vmul.f32 0.35355338, %v300_v3 }
 0x376   :  { %305 = vrot.lane.b32.xlu1 %v295_v5, %s3864_s2  ;;  %v323_v6 = vmul.f32 0.35355338, %v295_v5  ;;  %v3991_v7 = vpack.i.bf16 %v300_v3, %v295_v5 }
 0x378   :  { %3238 = vmatprep.mubr.msk.f32.mxu1 %vm335_vm12, %v323_v6 }
 0x379   :  { %317 = vrot.lane.b32.xlu0 %v295_v5, %s3865_s30 }
 0x37a   :  { %313 = vrot.lane.b32.xlu1 %v300_v3, %s3866_s7 }
 0x37d   :  { %3637 = vrot.lane.b32.xlu0 %v3991_v7, %s3867_s8 }
 0x37e   :  { %311 = vrot.lane.b32.xlu1 %v295_v5, %s3866_s7 }
 0x382   :  { %319 = vrot.lane.b32.xlu1 %v300_v3, %s3865_s30 }
 0x3e7   :  { %v308_v8 = vpop.permute.xlu0 %307 }
 0x3e8   :  { %v306_v9 = vpop.permute.xlu1 %305  ;;  %v326_v32 = vmul.f32 0.35355338, %v308_v8 }
 0x3e9   :  { %v4000_v10 = vpack.i.bf16 %v308_v8, %v306_v9  ;;  %v325_v24 = vmul.f32 0.35355338, %v306_v9 }
 0x3eb   :  { %v318_v11 = vpop.permute.xlu0 %317  ;;  %3642 = vrot.lane.b32.xlu1 %v4000_v10, %s3867_s8 }
 0x3ec   :  { %v329_v12 = vmul.f32 0.35355338, %v318_v11  ;;  %v314_v13 = vpop.permute.xlu1 %313 }
 0x3ed   :  { %v328_v39 = vmul.f32 0.35355338, %v314_v13 }
 0x3ee   :  { %3259 = vmatprep.mubr.msk.f32.mxu0 %vm335_vm12, %v329_v12 }
 0x3ef   :  { %v3638_v14 = vpop.permute.xlu0 %3637 }
 0x3f0   :  { %v3640_v15 = vunpack.i.h.bf16 %v3638_v14  ;;  %v3639_v16 = vunpack.i.l.bf16 %v3638_v14  ;;  %v312_v17 = vpop.permute.xlu1 %311 }
 0x3f1   :  { %v4005_v18 = vpack.i.bf16 %v314_v13, %v312_v17  ;;  %v327_v34 = vmul.f32 0.35355338, %v312_v17 }
 0x3f2   :  { %v3463_v20 = vpack.c.bf16 %v3640_v15, %v3639_v16 }
 0x3f3   :  { %3647 = vrot.lane.b32.xlu0 %v4005_v18, %s3867_s8 }
 0x3f4   :  { %3465 = vmatprep.subr.msk.bf16.mxu1 %vm4009_vm13, %v3463_v20  ;;  %v320_v21 = vpop.permute.xlu1 %319 }
 0x3f5   :  { %v4017_v22 = vpack.i.bf16 %v320_v21, %v318_v11  ;;  %3468 = vmatpush3.bf16.xpose.msk.msra.mxu1 %vm4009_vm13, %v3463_v20  ;;  %v330_v40 = vmul.f32 0.35355338, %v320_v21 }
 0x3f7   :  { %3652 = vrot.lane.b32.xlu1 %v4017_v22, %s3867_s8 }
 0x3fc   :  { %3239 = vmatmul.mubr.msk.f32.vlgmr.msra.gmra.mrb[2].mxu1 %vm335_vm12, %v324_v23 }
 0x3fd   :  { %3245 = vmatprep.mubr.msk.f32.mxu1 %vm335_vm12, %v325_v24 }
 0x45d   :  { %v3643_v25 = vpop.permute.xlu1 %3642 }
 0x45e   :  { %v3645_v26 = vunpack.i.h.bf16 %v3643_v25  ;;  %v3644_v27 = vunpack.i.l.bf16 %v3643_v25 }
 0x460   :  { %v3469_v28 = vpack.c.bf16 %v3645_v26, %v3644_v27 }
 0x462   :  { %3471 = vmatprep.subr.msk.bf16.mxu1 %vm4009_vm13, %v3469_v28 }
 0x463   :  { %3474 = vmatpush3.bf16.xpose.msk.msra.mxu1 %vm4009_vm13, %v3469_v28 }
 0x465   :  { %v3648_v29 = vpop.permute.xlu0 %3647 }
 0x466   :  { %v3650_v30 = vunpack.i.h.bf16 %v3648_v29  ;;  %v3649_v31 = vunpack.i.l.bf16 %v3648_v29 }
 0x468   :  { %v3475_v33 = vpack.c.bf16 %v3650_v30, %v3649_v31 }
 0x469   :  { %v3653_v35 = vpop.permute.xlu1 %3652 }
 0x46a   :  { %v3655_v36 = vunpack.i.h.bf16 %v3653_v35  ;;  %v3654_v37 = vunpack.i.l.bf16 %v3653_v35  ;;  %3246 = vmatmul.mubr.msk.f32.vlgmr.msra.gmra.mrb[4].mxu1 %vm335_vm12, %v326_v32  ;;  %3477 = vmatprep.subr.msk.bf16.mxu1 %vm4009_vm13, %v3475_v33 }
 0x46b   :  { %3480 = vmatpush3.bf16.xpose.msk.msra.mxu1 %vm4009_vm13, %v3475_v33  ;;  %3252 = vmatprep.mubr.msk.f32.mxu1 %vm335_vm12, %v327_v34 }
 0x46c   :  { %v3481_v38 = vpack.c.bf16 %v3655_v36, %v3654_v37 }
 0x46e   :  { %3483 = vmatprep.subr.msk.bf16.mxu0 %vm4009_vm13, %v3481_v38 }
 0x46f   :  { %3486 = vmatpush3.bf16.xpose.msk.msra.mxu0 %vm4009_vm13, %v3481_v38 }
 0x472   :  { %3253 = vmatmul.mubr.msk.f32.vlgmr.msra.gmra.mrb[6].mxu1 %vm335_vm12, %v328_v39 }
 0x476   :  { %3260 = vmatmul.mubr.msk.f32.vlgmr.msra.gmra.mrb[2].mxu0 %vm335_vm12, %v330_v40 }
 0x4cf   :  { %v3240_v48 = vpop.f32.mrb[2].mxu1 }
 0x4d0   :  { %v693_v49 = vsel %vm193_vm14, -1e+09, %v3240_v48  ;;  %v412_v50 = vpop.f32.mrb[3].mxu1 }
 0x4d1   :  { %v692_v51 = vsel %vm192_vm15, -1e+09, %v412_v50  ;;  %v704_v52 = vsel %vm700_vm0, %v693_v49, -inf }
 0x4d2   :  { %705 = vmax.xlane.f32.xlu1 %v704_v52  ;;  %v701_v53 = vsel %vm700_vm0, %v692_v51, -inf }
 0x4d3   :  { %702 = vmax.xlane.f32.xlu0 %v701_v53 }
 0x53d   :  { %v3247_v54 = vpop.f32.mrb[4].mxu1 }
 0x53e   :  { %v695_v55 = vsel %vm193_vm14, -1e+09, %v3247_v54  ;;  %v501_v56 = vpop.f32.mrb[5].mxu1 }
 0x53f   :  { %v710_v57 = vsel %vm700_vm0, %v695_v55, -inf  ;;  %v694_v58 = vsel %vm192_vm15, -1e+09, %v501_v56 }
 0x540   :  { %711 = vmax.xlane.f32.xlu0 %v710_v57  ;;  %v707_v59 = vsel %vm700_vm0, %v694_v58, -inf }
 0x544   :  { %708 = vmax.xlane.f32.xlu0 %v707_v59 }
 0x545   :  { %v3254_v60 = vpop.f32.mrb[6].mxu1 }
 0x546   :  { %v697_v61 = vsel %vm193_vm14, -1e+09, %v3254_v60  ;;  %v590_v62 = vpop.f32.mrb[7].mxu1 }
 0x547   :  { %v716_v1 = vsel %vm700_vm0, %v697_v61, -inf  ;;  %v4076_v9 = vsel %vm192_vm15, -1e+09, %v590_v62 }
 0x548   :  { %717 = vmax.xlane.f32.xlu0 %v716_v1  ;;  %v713_v11 = vsel %vm700_vm0, %v4076_v9, -inf }
 0x549   :  { %v3261_v2 = vpop.f32.mrb[2].mxu0 }
 0x54a   :  { %v699_v3 = vsel %vm193_vm14, -1e+09, %v3261_v2  ;;  %v679_v4 = vpop.f32.mrb[3].mxu0 }
 0x54b   :  { %v698_v5 = vsel %vm192_vm15, -1e+09, %v679_v4  ;;  %v722_v6 = vsel %vm700_vm0, %v699_v3, -inf }
 0x54c   :  { %723 = vmax.xlane.f32.xlu0 %v722_v6  ;;  %v719_v8 = vsel %vm700_vm0, %v698_v5, -inf }
 0x54d   :  { %720 = vmax.xlane.f32.xlu1 %v719_v8 }
 0x551   :  { %714 = vmax.xlane.f32.xlu1 %v713_v11 }
 0x55f   :  { %v706_v12 = vpop.xlane.xlu1 %705 }
 0x560   :  { %v726_v13 = vsub.f32 %v693_v49, %v706_v12  ;;  %v703_v15 = vpop.xlane.xlu0 %702 }
 0x561   :  { %v725_v20 = vsub.f32 %v692_v51, %v703_v15 }
 0x562   :  { %v735_v14 = vmul.f32 1.442695, %v726_v13  ;;  %3657 = vrot.lane.b32.xlu1 %v3991_v7, %s3868_s1 }
 0x563   :  { %v733_v21 = vmul.f32 1.442695, %v725_v20 }
 0x564   :  { %3740 = vpow2.f32 %v735_v14 }
 0x565   :  { %3742 = vpow2.f32 %v733_v21 }
 0x56e   :  { %v4082_v16 = vpop.eup %3740 }
 0x56f   :  { %v752_v17 = vsel %vm700_vm0, %v4082_v16, 0.0  ;;  %v3743_v23 = vpop.eup %3742 }
 0x570   :  { %753 = vadd.xlane.f32.xlu0 %v752_v17  ;;  %v749_v24 = vsel %vm700_vm0, %v3743_v23, 0.0 }
 0x586   :  { %750 = vadd.xlane.f32.xlu1 %v749_v24 }
 0x5cd   :  { %v712_v25 = vpop.xlane.xlu0 %711 }
 0x5ce   :  { %v728_v26 = vsub.f32 %v695_v55, %v712_v25 }
 0x5d0   :  { %v739_v27 = vmul.f32 1.442695, %v728_v26 }
 0x5d1   :  { %v709_v28 = vpop.xlane.xlu0 %708 }
 0x5d2   :  { %3744 = vpow2.f32 %v739_v27  ;;  %v727_v7 = vsub.f32 %v694_v58, %v709_v28 }
 0x5d4   :  { %v737_v29 = vmul.f32 1.442695, %v727_v7 }
 0x5d5   :  { %v718_v30 = vpop.xlane.xlu0 %717 }
 0x5d6   :  { %3746 = vpow2.f32 %v737_v29  ;;  %v730_v31 = vsub.f32 %v697_v61, %v718_v30 }
 0x5d8   :  { %v743_v37 = vmul.f32 1.442695, %v730_v31 }
 0x5d9   :  { %v724_v32 = vpop.xlane.xlu0 %723 }
 0x5da   :  { %v732_v33 = vsub.f32 %v699_v3, %v724_v32  ;;  %v721_v34 = vpop.xlane.xlu1 %720 }
 0x5db   :  { %v731_v35 = vsub.f32 %v698_v5, %v721_v34 }
 0x5dc   :  { %v4087_v36 = vpop.eup %3744  ;;  %v747_v38 = vmul.f32 1.442695, %v732_v33 }
 0x5dd   :  { %v745_v39 = vmul.f32 1.442695, %v731_v35  ;;  %v758_v40 = vsel %vm700_vm0, %v4087_v36, 0.0 }
 0x5de   :  { %3748 = vpow2.f32 %v747_v38  ;;  %759 = vadd.xlane.f32.xlu0 %v758_v40  ;;  %v715_v48 = vpop.xlane.xlu1 %714 }
 0x5df   :  { %3750 = vpow2.f32 %v745_v39  ;;  %v729_v61 = vsub.f32 %v4076_v9, %v715_v48  ;;  %v3681_v9 = vpack.i.bf16 %v3968_v47, %v3959_v44 }
 0x5e0   :  { %v3747_v49 = vpop.eup %3746  ;;  %3752 = vpow2.f32 %v743_v37 }
 0x5e1   :  { %v755_v50 = vsel %vm700_vm0, %v3747_v49, 0.0  ;;  %v741_v62 = vmul.f32 1.442695, %v729_v61 }
 0x5e2   :  { %756 = vadd.xlane.f32.xlu1 %v755_v50  ;;  %v3658_v51 = vpop.permute.xlu1 %3657 }
 0x5e3   :  { %v3660_v52 = vunpack.i.h.bf16 %v3658_v51  ;;  %v3659_v53 = vunpack.i.l.bf16 %v3658_v51  ;;  %3754 = vpow2.f32 %v741_v62 }
 0x5e5   :  { %v3487_v54 = vpack.c.bf16 %v3660_v52, %v3659_v53 }
 0x5e7   :  { %3488 = vmatprep.subr.bf16.mxu1 %v3487_v54 }
 0x5e8   :  { %v4092_v55 = vpop.eup %3748  ;;  %3490 = vmatpush3.bf16.msra.mxu1 %v3487_v54 }
 0x5e9   :  { %v3751_v56 = vpop.eup %3750  ;;  %v770_v57 = vsel %vm700_vm0, %v4092_v55, 0.0 }
 0x5ea   :  { %v4096_v58 = vpop.eup %3752  ;;  %771 = vadd.xlane.f32.xlu0 %v770_v57  ;;  %v767_v59 = vsel %vm700_vm0, %v3751_v56, 0.0 }
 0x5eb   :  { %768 = vadd.xlane.f32.xlu1 %v767_v59  ;;  %v764_v60 = vsel %vm700_vm0, %v4096_v58, 0.0 }
 0x5ed   :  { %v3755_v3 = vpop.eup %3754 }
 0x5ee   :  { %765 = vadd.xlane.f32.xlu0 %v764_v60  ;;  %v761_v6 = vsel %vm700_vm0, %v3755_v3, 0.0 }
 0x5fc   :  { %3667 = vrot.lane.b32.xlu1 %v4005_v18, %s3868_s1 }
 0x5fd   :  { %v754_v1 = vpop.xlane.xlu0 %753 }
 0x5fe   :  { %3756 = vrcp.f32 %v754_v1 }
 0x604   :  { %3662 = vrot.lane.b32.xlu0 %v4000_v10, %s3868_s1 }
 0x608   :  { %v3757_v4 = vpop.eup %3756  ;;  %3677 = vrot.lane.b32.xlu0 %v3676_v45, %s3869_s12 }
 0x609   :  { %v782_v11 = vmul.f32 %v3757_v4, %v4082_v16 }
 0x613   :  { %v751_v2 = vpop.xlane.xlu1 %750 }
 0x614   :  { %3758 = vrcp.f32 %v751_v2 }
 0x61e   :  { %v3759_v5 = vpop.eup %3758 }
 0x61f   :  { %v781_v8 = vmul.f32 %v3759_v5, %v3743_v23 }
 0x620   :  { %762 = vadd.xlane.f32.xlu1 %v761_v6 }
 0x621   :  { %3266 = vmatprep.mubr.msk.f32.mxu1 %vm700_vm0, %v781_v8 }
 0x622   :  { %3267 = vmatmul.mubr.msk.f32.vlgmr.msra.gmra.mrb[8].mxu1 %vm700_vm0, %v782_v11 }
 0x631   :  { %3672 = vrot.lane.b32.xlu1 %v4017_v22, %s3868_s1 }
 0x635   :  { %3682 = vrot.lane.b32.xlu1 %v3681_v9, %s3869_s12 }
 0x66b   :  { %v760_v18 = vpop.xlane.xlu0 %759 }
 0x66f   :  { %v757_v10 = vpop.xlane.xlu1 %756 }
 0x670   :  { %3760 = vrcp.f32 %v757_v10  ;;  %v2997_v10 = vld [vmem:[%s4483_s3 + $0x1] ss:$0 sm:$0xff] }
 0x671   :  { %3762 = vrcp.f32 %v760_v18 }
 0x677   :  { %v772_v12 = vpop.xlane.xlu0 %771 }
 0x678   :  { %v769_v13 = vpop.xlane.xlu1 %768 }
 0x679   :  { %3764 = vrcp.f32 %v769_v13 }
 0x67a   :  { %v3761_v14 = vpop.eup %3760  ;;  %3766 = vrcp.f32 %v772_v12 }
 0x67b   :  { %v766_v22 = vpop.xlane.xlu0 %765  ;;  %v783_v15 = vmul.f32 %v3761_v14, %v3747_v49  ;;  %v3763_v43 = vpop.eup %3762 }
 0x67c   :  { %v3668_v16 = vpop.permute.xlu1 %3667  ;;  %v784_v24 = vmul.f32 %v3763_v43, %v4087_v36  ;;  %3768 = vrcp.f32 %v766_v22 }
 0x67d   :  { %v3670_v17 = vunpack.i.h.bf16 %v3668_v16  ;;  %v3669_v20 = vunpack.i.l.bf16 %v3668_v16  ;;  %3273 = vmatprep.mubr.msk.f32.mxu1 %vm700_vm0, %v783_v15 }
 0x67f   :  { %v3495_v44 = vpack.c.bf16 %v3670_v17, %v3669_v20  ;;  %v3663_v47 = vpop.permute.xlu0 %3662 }
 0x680   :  { %v3665_v21 = vunpack.i.h.bf16 %v3663_v47  ;;  %v3664_v23 = vunpack.i.l.bf16 %v3663_v47 }
 0x681   :  { %3496 = vmatprep.subr.bf16.mxu0 %v3495_v44 }
 0x682   :  { %v3491_v42 = vpack.c.bf16 %v3665_v21, %v3664_v23  ;;  %3498 = vmatpush3.bf16.msra.mxu0 %v3495_v44 }
 0x683   :  { %v3765_v45 = vpop.eup %3764  ;;  %v3678_v39 = vpop.permute.xlu0 %3677 }
 0x684   :  { %3492 = vmatprep.subr.bf16.mxu1 %v3491_v42  ;;  %v787_v25 = vmul.f32 %v3765_v45, %v3751_v56  ;;  %v3767_v30 = vpop.eup %3766  ;;  %v3680_v49 = vunpack.i.h.bf16 %v3678_v39  ;;  %v3679_v50 = vunpack.i.l.bf16 %v3678_v39 }
 0x685   :  { %3494 = vmatpush3.bf16.msra.mxu1 %v3491_v42  ;;  %v788_v33 = vmul.f32 %v3767_v30, %v4092_v55 }
 0x686   :  { %v3769_v31 = vpop.eup %3768  ;;  %v3503_v52 = vpack.c.bf16 %v3680_v49, %v3679_v50 }
 0x687   :  { %v786_v35 = vmul.f32 %v3769_v31, %v4096_v58 }
 0x688   :  { %3274 = vmatmul.mubr.msk.f32.vlgmr.msra.gmra.mrb[10].mxu1 %vm700_vm0, %v784_v24  ;;  %3504 = vmatprep.subr.bf16.mxu0 %v3503_v52  ;;  %v199_v24 = vld [vmem:[%s4485_s5 + $0x8] sm:$0xff] }
 0x689   :  { %3287 = vmatprep.mubr.msk.f32.mxu1 %vm700_vm0, %v787_v25 }
 0x6ad   :  { %v763_v26 = vpop.xlane.xlu1 %762 }
 0x6ae   :  { %3770 = vrcp.f32 %v763_v26  ;;  %v200_v26 = vld [vmem:[%s4485_s5 + $0x10] sm:$0xff] }
 0x6b1   :  { %v3673_v27 = vpop.permute.xlu1 %3672 }
 0x6b2   :  { %v3675_v28 = vunpack.i.h.bf16 %v3673_v27  ;;  %v3674_v7 = vunpack.i.l.bf16 %v3673_v27  ;;  %v201_v27 = vld [vmem:[%s4485_s5 + $0x18] sm:$0xff] }
 0x6b4   :  { %v3499_v29 = vpack.c.bf16 %v3675_v28, %v3674_v7  ;;  %v3515_v28 = vpack.c.bf16 %v201_v27, %v200_v26 }
 0x6b5   :  { %v3683_v38 = vpop.permute.xlu1 %3682 }
 0x6b6   :  { %3500 = vmatprep.subr.bf16.mxu1 %v3499_v29  ;;  %v3685_v40 = vunpack.i.h.bf16 %v3683_v38  ;;  %v3684_v48 = vunpack.i.l.bf16 %v3683_v38 }
 0x6b7   :  { %3502 = vmatpush3.bf16.msra.mxu1 %v3499_v29 }
 0x6b8   :  { %v3771_v32 = vpop.eup %3770  ;;  %v3507_v51 = vpack.c.bf16 %v3685_v40, %v3684_v48 }
 0x6b9   :  { %v785_v34 = vmul.f32 %v3771_v32, %v3755_v3 }
 0x6ba   :  { %3288 = vmatmul.mubr.msk.f32.vlgmr.msra.gmra.mrb[12].mxu1 %vm700_vm0, %v788_v33 }
 0x6bb   :  { %3280 = vmatprep.mubr.msk.f32.mxu0 %vm700_vm0, %v785_v34 }
 0x6bc   :  { %3281 = vmatmul.mubr.msk.f32.vlgmr.msra.gmra.mrb[4].mxu0 %vm700_vm0, %v786_v35  ;;  %v3000_v35 = vld [vmem:[%s4483_s3 + $0x2] ss:$0 sm:$0xff] }
 0x6bd   :  { %3506 = vmatpush3.bf16.msra.mxu0 %v3503_v52  ;;  %v203_v52 = vld [vmem:[%s4485_s5 + $0x28] sm:$0xff] }
 0x6be   :  { %3508 = vmatprep.subr.bf16.mxu0 %v3507_v51 }
 0x6c1   :  { %3510 = vmatpush3.bf16.msra.mxu0 %v3507_v51  ;;  %v202_v51 = vld [vmem:[%s4485_s5 + $0x20] sm:$0xff] }
 0x6f5   :  { %v3268_v36 = vpop.f32.mrb[8].mxu1 }
 0x6f6   :  { %v867_v37 = vpop.f32.mrb[9].mxu1 }
 0x75b   :  { %v3275_v53 = vpop.f32.mrb[10].mxu1 }
 0x75c   :  { %1141 = vrot.lane.b32.xlu1 %v3275_v53, %s3870_s13  ;;  %v954_v54 = vpop.f32.mrb[11].mxu1  ;;  %v3519_v53 = vpack.c.bf16 %v203_v52, %v202_v51 }
 0x75d   :  { %1139 = vrot.lane.b32.xlu0 %v954_v54, %s3870_s13  ;;  %v204_v54 = vld [vmem:[%s4485_s5 + $0x30] sm:$0xff] }
 0x75e   :  { %3520 = vmatprep.subr.bf16.mxu0 %v3519_v53 }
 0x78d   :  { %v3289_v55 = vpop.f32.mrb[12].mxu1 }
 0x78e   :  { %v1128_v56 = vpop.f32.mrb[13].mxu1 }
 0x78f   :  { %v3282_v57 = vpop.f32.mrb[4].mxu0 }
 0x790   :  { %v1041_v58 = vpop.f32.mrb[5].mxu0  ;;  %1149 = vrot.lane.b32.xlu1 %v3282_v57, %s3871_s14  ;;  %v206_v57 = vld [vmem:[%s4485_s5 + $0x40] sm:$0xff] }
 0x791   :  { %1147 = vrot.lane.b32.xlu0 %v1041_v58, %s3871_s14  ;;  %v207_v58 = vld [vmem:[%s4485_s5 + $0x48] sm:$0xff] }
 0x794   :  { %1157 = vrot.lane.b32.xlu1 %v3289_v55, %s3872_s15  ;;  %v205_v55 = vld [vmem:[%s4485_s5 + $0x38] sm:$0xff] }
 0x795   :  { %1155 = vrot.lane.b32.xlu0 %v1128_v56, %s3872_s15  ;;  %v3523_v56 = vpack.c.bf16 %v205_v55, %v204_v54 }
 0x7ce   :  { %v1142_v59 = vpop.permute.xlu1 %1141 }
 0x7cf   :  { %v1140_v60 = vpop.permute.xlu0 %1139  ;;  %v1162_v3 = vsel %vm335_vm12, %v3268_v36, %v1142_v59  ;;  %v3527_v59 = vpack.c.bf16 %v207_v58, %v206_v57 }
 0x7d0   :  { %v1161_v1 = vsel %vm335_vm12, %v867_v37, %v1140_v60  ;;  %v3001_v37 = vld [vmem:[%s4483_s3 + $0x3] ss:$0 sm:$0xff]  ;;  %v208_v60 = vld [vmem:[%s4485_s5 + $0x50] sm:$0xff] }
 0x802   :  { %v1150_v61 = vpop.permute.xlu1 %1149 }
 0x803   :  { %v1148_v62 = vpop.permute.xlu0 %1147  ;;  %v1164_v6 = vsel %vm700_vm0, %v1162_v3, %v1150_v61  ;;  %v209_v61 = vld [vmem:[%s4485_s5 + $0x58] sm:$0xff] }
 0x804   :  { %v1163_v4 = vsel %vm700_vm0, %v1161_v1, %v1148_v62  ;;  %v3531_v62 = vpack.c.bf16 %v209_v61, %v208_v60  ;;  %v3002_v1 = vld [vmem:[%s4483_s3 + $0x4] ss:$0 sm:$0xff] }
 0x806   :  { %v1158_v2 = vpop.permute.xlu1 %1157 }
 0x807   :  { %v1156_v5 = vpop.permute.xlu0 %1155  ;;  %v1167_v11 = vsel %vm1165_vm1, %v1164_v6, %v1158_v2 }
 0x808   :  { %v1166_v8 = vsel %vm1165_vm1, %v1163_v4, %v1156_v5 }
 0x809   :  { %3298 = vmatprep.mubr.msk.f32.mxu0 %vm150_vm11, %v1166_v8 }
 0x80a   :  { %3299 = vmatmul.mubr.msk.f32.vlgmr.msra.gmra.mrb[6].mxu0 %vm150_vm11, %v1167_v11 }
 0x80b   :  { %3522 = vmatpush3.bf16.msra.mxu0 %v3519_v53 }
 0x80c   :  { %3524 = vmatprep.subr.bf16.mxu0 %v3523_v56 }
 0x80f   :  { %3526 = vmatpush3.bf16.msra.mxu0 %v3523_v56 }
 0x810   :  { %3528 = vmatprep.subr.bf16.mxu0 %v3527_v59 }
 0x813   :  { %3530 = vmatpush3.bf16.msra.mxu0 %v3527_v59  ;;  %v3005_v59 = vld [vmem:[%s4483_s3 + $0x5] ss:$0 sm:$0xff] }
 0x814   :  { %3532 = vmatprep.subr.bf16.mxu0 %v3531_v62 }
 0x817   :  { %3534 = vmatpush3.bf16.msra.mxu0 %v3531_v62 }
 0x8dd   :  { %v3300_v18 = vpop.f32.mrb[6].mxu0 }
 0x8de   :  { %v1266_v9 = vadd.f32 %v3300_v18, %v2997_v10  ;;  %v1260_v12 = vpop.f32.mrb[7].mxu0 }
 0x8df   :  { %v1261_v13 = vadd.f32 %v2997_v10, %v1260_v12 }
 0x8e0   :  { %v1270_v14 = vadd.f32 %v1266_v9, %v3980_v0 }
 0x8e1   :  { %v1269_v22 = vadd.f32 %v1261_v13, %v3978_v63  ;;  %v198_v63 = vld [vmem:[%s4485_s5] sm:$0xff] }
 0x8e2   :  { %v1274_v15 = vsel %vm150_vm11, %v1270_v14, 0.0  ;;  %v3511_v25 = vpack.c.bf16 %v199_v24, %v198_v63 }
 0x8e3   :  { %1275 = vadd.xlane.f32.xlu1 %v1274_v15  ;;  %v1271_v16 = vsel %vm150_vm11, %v1269_v22, 0.0 }
 0x8e4   :  { %1272 = vadd.xlane.f32.xlu0 %v1271_v16  ;;  %3512 = vmatprep.subr.bf16.mxu1 %v3511_v25 }
 0x8e5   :  { %3514 = vmatpush3.bf16.msra.mxu1 %v3511_v25 }
 0x8e6   :  { %3516 = vmatprep.subr.bf16.mxu1 %v3515_v28 }
 0x8e9   :  { %3518 = vmatpush3.bf16.msra.mxu1 %v3515_v28 }
 0x970   :  { %v1276_v17 = vpop.xlane.xlu1 %1275 }
 0x971   :  { %v1278_v20 = vmul.f32 0.03125, %v1276_v17  ;;  %v1273_v44 = vpop.xlane.xlu0 %1272 }
 0x972   :  { %v1277_v47 = vmul.f32 0.03125, %v1273_v44 }
 0x973   :  { %v1280_v21 = vsub.f32 %v1270_v14, %v1278_v20 }
 0x974   :  { %v1279_v23 = vsub.f32 %v1269_v22, %v1277_v47 }
 0x975   :  { %v1282_v45 = vmul.f32 %v1280_v21, %v1280_v21 }
 0x976   :  { %v1281_v42 = vmul.f32 %v1279_v23, %v1279_v23 }
 0x977   :  { %v1286_v0 = vsel %vm150_vm11, %v1282_v45, 0.0 }
 0x978   :  { %v1283_v43 = vsel %vm150_vm11, %v1281_v42, 0.0 }
 0x979   :  { %1284 = vadd.xlane.f32.xlu0 %v1283_v43 }
 0x97d   :  { %1287 = vadd.xlane.f32.xlu0 %v1286_v0 }
 0xa06   :  { %v1285_v7 = vpop.xlane.xlu0 %1284 }
 0xa07   :  { %v1289_v29 = vmul.f32 0.03125, %v1285_v7 }
 0xa09   :  { %v1291_v30 = vadd.f32 1e-05, %v1289_v29 }
 0xa0a   :  { %v1288_v31 = vpop.xlane.xlu0 %1287 }
 0xa0b   :  { %3772 = vrsqrt.f32 %v1291_v30  ;;  %v1290_v32 = vmul.f32 0.03125, %v1288_v31 }
 0xa0d   :  { %v1292_v33 = vadd.f32 1e-05, %v1290_v32 }
 0xa0f   :  { %3774 = vrsqrt.f32 %v1292_v33 }
 0xa15   :  { %v3773_v34 = vpop.eup %3772 }
 0xa16   :  { %v1295_v36 = vmul.f32 %v3773_v34, %v1279_v23 }
 0xa18   :  { %v1301_v38 = vmul.f32 %v3000_v35, %v1295_v36 }
 0xa19   :  { %v3775_v39 = vpop.eup %3774 }
 0xa1a   :  { %v1296_v40 = vmul.f32 %v3775_v39, %v1280_v21  ;;  %v4169_v48 = vadd.f32 %v3001_v37, %v1301_v38 }
 0xa1c   :  { %v1302_v49 = vmul.f32 %v3000_v35, %v1296_v40  ;;  %3309 = vmatprep.mubr.msk.f32.mxu1 %vm150_vm11, %v4169_v48 }
 0xa1e   :  { %v4173_v50 = vadd.f32 %v3001_v37, %v1302_v49 }
 0xa20   :  { %3310 = vmatmul.mubr.msk.f32.vlgmr.msra.gmra.mrb[14].mxu1 %vm150_vm11, %v4173_v50 }
 0xaf3   :  { %v3311_v2 = vpop.f32.mrb[14].mxu1 }
 0xaf4   :  { %v1391_v3 = vadd.f32 %v3311_v2, %v3002_v1  ;;  %v1385_v4 = vpop.f32.mrb[15].mxu1 }
 0xaf5   :  { %v1386_v5 = vadd.f32 %v3002_v1, %v1385_v4 }
 0xaf6   :  { %v1397_v6 = vmul.f32 0.70710677, %v1391_v3  ;;  %v1395_v56 = vmul.f32 0.5, %v1391_v3 }
 0xaf7   :  { %v1396_v8 = vmul.f32 0.70710677, %v1386_v5  ;;  %v1394_v54 = vmul.f32 0.5, %v1386_v5 }
 0xaf8   :  { %v1399_v11 = vand.u32 2147483647, %v1397_v6  ;;  %vm1439_vm2 = vcmp.ge.f32.partialorder %v1397_v6, 0.0 }
 0xaf9   :  { %v1398_v10 = vand.u32 2147483647, %v1396_v8  ;;  %vm1438_vm3 = vcmp.ge.f32.partialorder %v1396_v8, 0.0 }
 0xafa   :  { %v1401_v18 = vmul.f32 0.3275911, %v1399_v11  ;;  %v1427_v14 = vsub.f32 0.0, %v1399_v11 }
 0xafb   :  { %v1400_v9 = vmul.f32 0.3275911, %v1398_v10  ;;  %v1426_v22 = vsub.f32 0.0, %v1398_v10 }
 0xafc   :  { %v1403_v12 = vadd.f32 1.0, %v1401_v18  ;;  %v1429_v16 = vmul.f32 %v1427_v14, %v1399_v11 }
 0xafd   :  { %v1402_v13 = vadd.f32 1.0, %v1400_v9  ;;  %v1428_v44 = vmul.f32 %v1426_v22, %v1398_v10  ;;  %v4223_v22 = vld [vmem:[%s4484_s4 + $0x28] sm:$0xff] }
 0xafe   :  { %3776 = vrcp.f32 %v1403_v12  ;;  %v1432_v23 = vmul.f32 1.442695, %v1429_v16  ;;  %v4230_v16 = vld [vmem:[%s4484_s4 + $0x30] sm:$0xff] }
 0xaff   :  { %3778 = vrcp.f32 %v1402_v13  ;;  %v1430_v45 = vmul.f32 1.442695, %v1428_v44 }
 0xb00   :  { %3780 = vpow2.f32 %v1432_v23 }
 0xb01   :  { %3782 = vpow2.f32 %v1430_v45 }
 0xb08   :  { %v3777_v15 = vpop.eup %3776 }
 0xb09   :  { %v3779_v17 = vpop.eup %3778  ;;  %v1409_v20 = vmul.f32 1.0614054, %v3777_v15 }
 0xb0a   :  { %v1408_v47 = vmul.f32 1.0614054, %v3779_v17  ;;  %v3781_v33 = vpop.eup %3780 }
 0xb0b   :  { %v1411_v21 = vadd.f32 -1.4531521, %v1409_v20  ;;  %v3783_v35 = vpop.eup %3782 }
 0xb0c   :  { %v1410_v42 = vadd.f32 -1.4531521, %v1408_v47 }
 0xb0d   :  { %v1413_v43 = vmul.f32 %v3777_v15, %v1411_v21 }
 0xb0e   :  { %v1412_v0 = vmul.f32 %v3779_v17, %v1410_v42 }
 0xb0f   :  { %v1415_v63 = vadd.f32 1.4214138, %v1413_v43 }
 0xb10   :  { %v1414_v24 = vadd.f32 1.4214138, %v1412_v0  ;;  %v3008_v0 = vld [vmem:[%s4483_s3 + $0x6] ss:$0 sm:$0xff] }
 0xb11   :  { %v1417_v25 = vmul.f32 %v3777_v15, %v1415_v63 }
 0xb12   :  { %v1416_v26 = vmul.f32 %v3779_v17, %v1414_v24 }
 0xb13   :  { %v1419_v27 = vadd.f32 -0.28449672, %v1417_v25 }
 0xb14   :  { %v1418_v28 = vadd.f32 -0.28449672, %v1416_v26  ;;  %v3009_v26 = vld [vmem:[%s4483_s3 + $0x7] ss:$0 sm:$0xff] }
 0xb15   :  { %v1421_v7 = vmul.f32 %v3777_v15, %v1419_v27 }
 0xb16   :  { %v1420_v29 = vmul.f32 %v3779_v17, %v1418_v28 }
 0xb17   :  { %v1423_v30 = vadd.f32 0.2548296, %v1421_v7 }
 0xb18   :  { %v1422_v31 = vadd.f32 0.2548296, %v1420_v29 }
 0xb19   :  { %v1425_v32 = vmul.f32 %v3777_v15, %v1423_v30  ;;  %v3034_v30 = vld [vmem:[%s4483_s3 + $0x8] ss:$0 sm:$0xff] }
 0xb1a   :  { %v1424_v34 = vmul.f32 %v3779_v17, %v1422_v31  ;;  %v4235_v17 = vld [vmem:[%s4484_s4 + $0x38] sm:$0xff] }
 0xb1b   :  { %v1435_v36 = vmul.f32 %v3781_v33, %v1425_v32  ;;  %v3539_v20 = vpack.c.bf16 %v4235_v17, %v4230_v16 }
 0xb1c   :  { %v1434_v37 = vmul.f32 %v3783_v35, %v1424_v34 }
 0xb1d   :  { %v1437_v38 = vsub.f32 1.0, %v1435_v36 }
 0xb1e   :  { %v1436_v39 = vsub.f32 1.0, %v1434_v37 }
 0xb1f   :  { %v1441_v40 = vsub.f32 0.0, %v1437_v38 }
 0xb20   :  { %v1440_v49 = vsub.f32 0.0, %v1436_v39 }
 0xb21   :  { %v1443_v51 = vsel %vm1439_vm2, %v1437_v38, %v1441_v40 }
 0xb22   :  { %v1445_v52 = vadd.f32 1.0, %v1443_v51  ;;  %v1442_v53 = vsel %vm1438_vm3, %v1436_v39, %v1440_v49 }
 0xb23   :  { %v1444_v55 = vadd.f32 1.0, %v1442_v53 }
 0xb24   :  { %v1447_v58 = vmul.f32 %v1445_v52, %v1395_v56 }
 0xb25   :  { %v1446_v57 = vmul.f32 %v1444_v55, %v1394_v54 }
 0xb27   :  { %3328 = vmatprep.mubr.msk.f32.mxu0 %vm66_vm9, %v1446_v57 }
 0xb28   :  { %3329 = vmatmul.mubr.msk.f32.vlgmr.msra.gmra.mrb[8].mxu0 %vm66_vm9, %v1447_v58 }
 0xbfb   :  { %v3330_v60 = vpop.f32.mrb[8].mxu0 }
 0xbfc   :  { %v1530_v61 = vadd.f32 %v3330_v60, %v3005_v59  ;;  %v1524_v62 = vpop.f32.mrb[9].mxu0 }
 0xbfd   :  { %v1525_v1 = vadd.f32 %v3005_v59, %v1524_v62 }
 0xbfe   :  { %v1534_v2 = vadd.f32 %v1530_v61, %v4173_v50 }
 0xbff   :  { %v1533_v4 = vadd.f32 %v1525_v1, %v4169_v48  ;;  %v4218_v48 = vld [vmem:[%s4484_s4 + $0x20] sm:$0xff] }
 0xc00   :  { %v1538_v3 = vsel %vm150_vm11, %v1534_v2, 0.0  ;;  %v3535_v15 = vpack.c.bf16 %v4223_v22, %v4218_v48 }
 0xc01   :  { %1539 = vadd.xlane.f32.xlu0 %v1538_v3  ;;  %v1535_v5 = vsel %vm150_vm11, %v1533_v4, 0.0 }
 0xc02   :  { %1536 = vadd.xlane.f32.xlu1 %v1535_v5  ;;  %3536 = vmatprep.subr.bf16.mxu1 %v3535_v15 }
 0xc03   :  { %3538 = vmatpush3.bf16.msra.mxu1 %v3535_v15 }
 0xc04   :  { %3540 = vmatprep.subr.bf16.mxu1 %v3539_v20 }
 0xc07   :  { %3542 = vmatpush3.bf16.msra.mxu1 %v3539_v20 }
 0xc8e   :  { %v1540_v6 = vpop.xlane.xlu0 %1539 }
 0xc8f   :  { %v1542_v8 = vmul.f32 0.03125, %v1540_v6  ;;  %v1537_v11 = vpop.xlane.xlu1 %1536 }
 0xc90   :  { %v1541_v10 = vmul.f32 0.03125, %v1537_v11 }
 0xc91   :  { %v1544_v18 = vsub.f32 %v1534_v2, %v1542_v8 }
 0xc92   :  { %v1543_v9 = vsub.f32 %v1533_v4, %v1541_v10 }
 0xc93   :  { %v1546_v12 = vmul.f32 %v1544_v18, %v1544_v18 }
 0xc94   :  { %v1545_v13 = vmul.f32 %v1543_v9, %v1543_v9 }
 0xc95   :  { %v1550_v14 = vsel %vm150_vm11, %v1546_v12, 0.0 }
 0xc96   :  { %1551 = vadd.xlane.f32.xlu0 %v1550_v14  ;;  %v1547_v50 = vsel %vm150_vm11, %v1545_v13, 0.0 }
 0xc97   :  { %1548 = vadd.xlane.f32.xlu1 %v1547_v50 }
 0xd23   :  { %v1552_v44 = vpop.xlane.xlu0 %1551 }
 0xd24   :  { %v1554_v47 = vmul.f32 0.03125, %v1552_v44  ;;  %v1549_v21 = vpop.xlane.xlu1 %1548 }
 0xd25   :  { %v1553_v23 = vmul.f32 0.03125, %v1549_v21 }
 0xd26   :  { %v1556_v42 = vadd.f32 1e-05, %v1554_v47 }
 0xd27   :  { %v1555_v43 = vadd.f32 1e-05, %v1553_v23 }
 0xd28   :  { %3784 = vrsqrt.f32 %v1556_v42 }
 0xd29   :  { %3786 = vrsqrt.f32 %v1555_v43 }
 0xd32   :  { %v3785_v45 = vpop.eup %3784 }
 0xd33   :  { %v3787_v63 = vpop.eup %3786  ;;  %v1560_v24 = vmul.f32 %v3785_v45, %v1544_v18 }
 0xd34   :  { %v1559_v25 = vmul.f32 %v3787_v63, %v1543_v9 }
 0xd35   :  { %v1566_v27 = vmul.f32 %v3008_v0, %v1560_v24 }
 0xd36   :  { %v1565_v28 = vmul.f32 %v3008_v0, %v1559_v25 }
 0xd37   :  { %v4247_v29 = vadd.f32 %v3009_v26, %v1566_v27 }
 0xd38   :  { %v4245_v7 = vadd.f32 %v3009_v26, %v1565_v28 }
 0xd3a   :  { %3339 = vmatprep.mubr.msk.f32.mxu1 %vm150_vm11, %v4245_v7 }
 0xd3b   :  { %3340 = vmatmul.mubr.msk.f32.vlgmr.msra.gmra.mrb[16].mxu1 %vm150_vm11, %v4247_v29 }
 0xe0e   :  { %v3341_v31 = vpop.f32.mrb[16].mxu1 }
 0xe0f   :  { %v1682_v32 = vadd.f32 %v3341_v31, %v3034_v30  ;;  %v1676_v33 = vpop.f32.mrb[17].mxu1 }
 0xe10   :  { %v1677_v34 = vadd.f32 %v3034_v30, %v1676_v33 }
 0xe11   :  { %1695 = vrot.lane.b32.xlu1 %v1682_v32, %s3866_s7  ;;  %1689 = vrot.lane.b32.xlu0 %v1682_v32, %s3864_s2  ;;  %v1706_v60 = vmul.f32 0.35355338, %v1682_v32 }
 0xe12   :  { %v1705_v35 = vmul.f32 0.35355338, %v1677_v34  ;;  %v4258_v36 = vpack.i.bf16 %v1682_v32, %v1677_v34 }
 0xe14   :  { %3346 = vmatprep.mubr.msk.f32.mxu1 %vm335_vm12, %v1705_v35 }
 0xe15   :  { %1699 = vrot.lane.b32.xlu0 %v1677_v34, %s3865_s30  ;;  %1687 = vrot.lane.b32.xlu1 %v1677_v34, %s3864_s2 }
 0xe19   :  { %3687 = vrot.lane.b32.xlu0 %v4258_v36, %s3867_s8  ;;  %1693 = vrot.lane.b32.xlu1 %v1677_v34, %s3866_s7 }
 0xe1d   :  { %1701 = vrot.lane.b32.xlu1 %v1682_v32, %s3865_s30 }
 0xe83   :  { %v1696_v37 = vpop.permute.xlu1 %1695  ;;  %v1690_v38 = vpop.permute.xlu0 %1689 }
 0xe84   :  { %v1708_v9 = vmul.f32 0.35355338, %v1690_v38  ;;  %v1710_v14 = vmul.f32 0.35355338, %v1696_v37 }
 0xe87   :  { %v1700_v39 = vpop.permute.xlu0 %1699  ;;  %v1688_v40 = vpop.permute.xlu1 %1687 }
 0xe88   :  { %v1707_v49 = vmul.f32 0.35355338, %v1688_v40  ;;  %v4267_v51 = vpack.i.bf16 %v1690_v38, %v1688_v40  ;;  %v1711_v13 = vmul.f32 0.35355338, %v1700_v39 }
 0xe8a   :  { %3353 = vmatprep.mubr.msk.f32.mxu0 %vm335_vm12, %v1707_v49  ;;  %3692 = vrot.lane.b32.xlu1 %v4267_v51, %s3867_s8 }
 0xe8b   :  { %v3688_v52 = vpop.permute.xlu0 %3687  ;;  %v1694_v53 = vpop.permute.xlu1 %1693 }
 0xe8c   :  { %v3690_v54 = vunpack.i.h.bf16 %v3688_v52  ;;  %v3689_v55 = vunpack.i.l.bf16 %v3688_v52  ;;  %v4272_v56 = vpack.i.bf16 %v1696_v37, %v1694_v53  ;;  %v1709_v61 = vmul.f32 0.35355338, %v1694_v53 }
 0xe8e   :  { %v3543_v57 = vpack.c.bf16 %v3690_v54, %v3689_v55  ;;  %3697 = vrot.lane.b32.xlu0 %v4272_v56, %s3867_s8 }
 0xe8f   :  { %v1702_v58 = vpop.permute.xlu1 %1701 }
 0xe90   :  { %v4276_v59 = vpack.i.bf16 %v1702_v58, %v1700_v39  ;;  %3545 = vmatprep.subr.msk.bf16.mxu1 %vm4009_vm13, %v3543_v57  ;;  %v1712_v50 = vmul.f32 0.35355338, %v1702_v58 }
 0xe91   :  { %3548 = vmatpush3.bf16.xpose.msk.msra.mxu1 %vm4009_vm13, %v3543_v57 }
 0xe92   :  { %3702 = vrot.lane.b32.xlu1 %v4276_v59, %s3867_s8 }
 0xe98   :  { %3347 = vmatmul.mubr.msk.f32.vlgmr.msra.gmra.mrb[18].mxu1 %vm335_vm12, %v1706_v60 }
 0xe99   :  { %3360 = vmatprep.mubr.msk.f32.mxu1 %vm335_vm12, %v1709_v61 }
 0xefc   :  { %v3693_v62 = vpop.permute.xlu1 %3692 }
 0xefd   :  { %v3695_v1 = vunpack.i.h.bf16 %v3693_v62  ;;  %v3694_v2 = vunpack.i.l.bf16 %v3693_v62 }
 0xeff   :  { %v3549_v4 = vpack.c.bf16 %v3695_v1, %v3694_v2 }
 0xf00   :  { %v3698_v3 = vpop.permute.xlu0 %3697 }
 0xf01   :  { %3551 = vmatprep.subr.msk.bf16.mxu0 %vm4009_vm13, %v3549_v4  ;;  %v3700_v5 = vunpack.i.h.bf16 %v3698_v3  ;;  %v3699_v6 = vunpack.i.l.bf16 %v3698_v3 }
 0xf02   :  { %3554 = vmatpush3.bf16.xpose.msk.msra.mxu0 %vm4009_vm13, %v3549_v4 }
 0xf03   :  { %v3555_v8 = vpack.c.bf16 %v3700_v5, %v3699_v6 }
 0xf04   :  { %v3703_v11 = vpop.permute.xlu1 %3702 }
 0xf05   :  { %v3705_v10 = vunpack.i.h.bf16 %v3703_v11  ;;  %v3704_v18 = vunpack.i.l.bf16 %v3703_v11  ;;  %3557 = vmatprep.subr.msk.bf16.mxu1 %vm4009_vm13, %v3555_v8 }
 0xf06   :  { %3560 = vmatpush3.bf16.xpose.msk.msra.mxu1 %vm4009_vm13, %v3555_v8 }
 0xf07   :  { %v3561_v12 = vpack.c.bf16 %v3705_v10, %v3704_v18 }
 0xf09   :  { %3354 = vmatmul.mubr.msk.f32.vlgmr.msra.gmra.mrb[10].mxu0 %vm335_vm12, %v1708_v9  ;;  %3563 = vmatprep.subr.msk.bf16.mxu0 %vm4009_vm13, %v3561_v12 }
 0xf0a   :  { %3566 = vmatpush3.bf16.xpose.msk.msra.mxu0 %vm4009_vm13, %v3561_v12  ;;  %3367 = vmatprep.mubr.msk.f32.mxu0 %vm335_vm12, %v1711_v13 }
 0xf0d   :  { %3361 = vmatmul.mubr.msk.f32.vlgmr.msra.gmra.mrb[20].mxu1 %vm335_vm12, %v1710_v14 }
 0xf11   :  { %3368 = vmatmul.mubr.msk.f32.vlgmr.msra.gmra.mrb[12].mxu0 %vm335_vm12, %v1712_v50 }
 0xf6b   :  { %v3348_v15 = vpop.f32.mrb[18].mxu1 }
 0xf6c   :  { %v2070_v20 = vsel %vm193_vm14, -1e+09, %v3348_v15  ;;  %v1793_v44 = vpop.f32.mrb[19].mxu1 }
 0xf6d   :  { %v2069_v47 = vsel %vm192_vm15, -1e+09, %v1793_v44  ;;  %v2080_v21 = vsel %vm700_vm0, %v2070_v20, -inf }
 0xf6e   :  { %2081 = vmax.xlane.f32.xlu1 %v2080_v21  ;;  %v2077_v19 = vsel %vm700_vm0, %v2069_v47, -inf }
 0xf6f   :  { %2078 = vmax.xlane.f32.xlu0 %v2077_v19 }
 0xfdc   :  { %v3355_v23 = vpop.f32.mrb[10].mxu0 }
 0xfdd   :  { %v2072_v42 = vsel %vm193_vm14, -1e+09, %v3355_v23  ;;  %v1882_v43 = vpop.f32.mrb[11].mxu0 }
 0xfde   :  { %v2086_v45 = vsel %vm700_vm0, %v2072_v42, -inf  ;;  %v2071_v0 = vsel %vm192_vm15, -1e+09, %v1882_v43 }
 0xfdf   :  { %2087 = vmax.xlane.f32.xlu0 %v2086_v45  ;;  %v2083_v25 = vsel %vm700_vm0, %v2071_v0, -inf }
 0xfe0   :  { %v3362_v63 = vpop.f32.mrb[20].mxu1 }
 0xfe1   :  { %v1971_v24 = vpop.f32.mrb[21].mxu1  ;;  %v2074_v26 = vsel %vm193_vm14, -1e+09, %v3362_v63 }
 0xfe2   :  { %v2073_v27 = vsel %vm192_vm15, -1e+09, %v1971_v24  ;;  %v2092_v33 = vsel %vm700_vm0, %v2074_v26, -inf }
 0xfe3   :  { %2084 = vmax.xlane.f32.xlu0 %v2083_v25  ;;  %v2089_v30 = vsel %vm700_vm0, %v2073_v27, -inf }
 0xfe4   :  { %v3369_v28 = vpop.f32.mrb[12].mxu0  ;;  %2090 = vmax.xlane.f32.xlu1 %v2089_v30 }
 0xfe5   :  { %v2060_v31 = vpop.f32.mrb[13].mxu0  ;;  %v2076_v34 = vsel %vm193_vm14, -1e+09, %v3369_v28 }
 0xfe6   :  { %v4321_v32 = vsel %vm192_vm15, -1e+09, %v2060_v31  ;;  %v2098_v37 = vsel %vm700_vm0, %v2076_v34, -inf }
 0xfe7   :  { %2093 = vmax.xlane.f32.xlu0 %v2092_v33  ;;  %v2095_v35 = vsel %vm700_vm0, %v4321_v32, -inf  ;;  %v3726_v33 = vpack.i.bf16 %v4223_v22, %v4218_v48 }
 0xfe8   :  { %2096 = vmax.xlane.f32.xlu1 %v2095_v35 }
 0xfeb   :  { %2099 = vmax.xlane.f32.xlu0 %v2098_v37 }
 0xff9   :  { %3707 = vrot.lane.b32.xlu1 %v4258_v36, %s3868_s1 }
 0xffb   :  { %v2082_v38 = vpop.xlane.xlu1 %2081 }
 0xffc   :  { %v2102_v46 = vsub.f32 %v2070_v20, %v2082_v38  ;;  %v2079_v40 = vpop.xlane.xlu0 %2078 }
 0xffd   :  { %v2101_v49 = vsub.f32 %v2069_v47, %v2079_v40 }
 0xffe   :  { %v2111_v39 = vmul.f32 1.442695, %v2102_v46 }
 0xfff   :  { %v2109_v53 = vmul.f32 1.442695, %v2101_v49 }
0x1000   :  { %3788 = vpow2.f32 %v2111_v39 }
0x1001   :  { %3790 = vpow2.f32 %v2109_v53 }
0x100a   :  { %v4331_v52 = vpop.eup %3788 }
0x100b   :  { %v2128_v41 = vsel %vm700_vm0, %v4331_v52, 0.0  ;;  %v3791_v54 = vpop.eup %3790 }
0x100c   :  { %2129 = vadd.xlane.f32.xlu0 %v2128_v41  ;;  %v2125_v55 = vsel %vm700_vm0, %v3791_v54, 0.0 }
0x101d   :  { %2126 = vadd.xlane.f32.xlu1 %v2125_v55 }
0x106c   :  { %v2088_v57 = vpop.xlane.xlu0 %2087 }
0x106d   :  { %v2104_v36 = vsub.f32 %v2072_v42, %v2088_v57 }
0x106f   :  { %v2115_v58 = vmul.f32 1.442695, %v2104_v36 }
0x1070   :  { %v2085_v60 = vpop.xlane.xlu0 %2084 }
0x1071   :  { %3792 = vpow2.f32 %v2115_v58  ;;  %v2103_v61 = vsub.f32 %v2071_v0, %v2085_v60  ;;  %v2091_v62 = vpop.xlane.xlu1 %2090 }
0x1072   :  { %v2105_v2 = vsub.f32 %v2073_v27, %v2091_v62 }
0x1073   :  { %v2113_v1 = vmul.f32 1.442695, %v2103_v61 }
0x1074   :  { %v2094_v4 = vpop.xlane.xlu0 %2093  ;;  %v2117_v3 = vmul.f32 1.442695, %v2105_v2 }
0x1075   :  { %3794 = vpow2.f32 %v2113_v1  ;;  %v2106_v5 = vsub.f32 %v2074_v26, %v2094_v4  ;;  %v2097_v6 = vpop.xlane.xlu1 %2096 }
0x1076   :  { %3796 = vpow2.f32 %v2117_v3  ;;  %v2107_v45 = vsub.f32 %v4321_v32, %v2097_v6  ;;  %v3731_v32 = vpack.i.bf16 %v4235_v17, %v4230_v16 }
0x1077   :  { %v2119_v8 = vmul.f32 1.442695, %v2106_v5 }
0x1078   :  { %v2100_v11 = vpop.xlane.xlu0 %2099  ;;  %v2121_v0 = vmul.f32 1.442695, %v2107_v45 }
0x1079   :  { %3798 = vpow2.f32 %v2119_v8  ;;  %v2108_v10 = vsub.f32 %v2076_v34, %v2100_v11  ;;  %v3708_v18 = vpop.permute.xlu1 %3707 }
0x107a   :  { %v3710_v13 = vunpack.i.h.bf16 %v3708_v18  ;;  %v3709_v14 = vunpack.i.l.bf16 %v3708_v18 }
0x107b   :  { %v4336_v9 = vpop.eup %3792  ;;  %v2123_v12 = vmul.f32 1.442695, %v2108_v10 }
0x107c   :  { %v2134_v50 = vsel %vm700_vm0, %v4336_v9, 0.0  ;;  %v3567_v15 = vpack.c.bf16 %v3710_v13, %v3709_v14 }
0x107d   :  { %3800 = vpow2.f32 %v2123_v12  ;;  %2135 = vadd.xlane.f32.xlu0 %v2134_v50 }
0x107e   :  { %3568 = vmatprep.subr.bf16.mxu1 %v3567_v15  ;;  %3802 = vpow2.f32 %v2121_v0 }
0x107f   :  { %v3795_v20 = vpop.eup %3794  ;;  %3570 = vmatpush3.bf16.msra.mxu1 %v3567_v15 }
0x1080   :  { %v2131_v44 = vsel %vm700_vm0, %v3795_v20, 0.0  ;;  %v3797_v47 = vpop.eup %3796 }
0x1081   :  { %2132 = vadd.xlane.f32.xlu1 %v2131_v44  ;;  %v2137_v23 = vsel %vm700_vm0, %v3797_v47, 0.0 }
0x1083   :  { %v3799_v21 = vpop.eup %3798 }
0x1084   :  { %v2140_v19 = vsel %vm700_vm0, %v3799_v21, 0.0 }
0x1085   :  { %2141 = vadd.xlane.f32.xlu0 %v2140_v19  ;;  %2138 = vadd.xlane.f32.xlu1 %v2137_v23 }
0x1087   :  { %v4343_v42 = vpop.eup %3800 }
0x1088   :  { %v2146_v43 = vsel %vm700_vm0, %v4343_v42, 0.0  ;;  %v3803_v25 = vpop.eup %3802 }
0x1089   :  { %2147 = vadd.xlane.f32.xlu0 %v2146_v43 }
0x1096   :  { %3717 = vrot.lane.b32.xlu1 %v4272_v56, %s3868_s1  ;;  %v2143_v56 = vsel %vm700_vm0, %v3803_v25, 0.0 }
0x1099   :  { %v2130_v63 = vpop.xlane.xlu0 %2129 }
0x109a   :  { %3804 = vrcp.f32 %v2130_v63 }
0x109f   :  { %3712 = vrot.lane.b32.xlu0 %v4267_v51, %s3868_s1 }
0x10a3   :  { %3727 = vrot.lane.b32.xlu0 %v3726_v33, %s3869_s12 }
0x10a4   :  { %v3805_v26 = vpop.eup %3804 }
0x10a5   :  { %v2158_v30 = vmul.f32 %v3805_v26, %v4331_v52 }
0x10aa   :  { %v2127_v24 = vpop.xlane.xlu1 %2126 }
0x10ab   :  { %3806 = vrcp.f32 %v2127_v24 }
0x10b5   :  { %v3807_v27 = vpop.eup %3806 }
0x10b6   :  { %v2157_v28 = vmul.f32 %v3807_v27, %v3791_v54 }
0x10b8   :  { %3374 = vmatprep.mubr.msk.f32.mxu1 %vm700_vm0, %v2157_v28 }
0x10b9   :  { %3375 = vmatmul.mubr.msk.f32.vlgmr.msra.gmra.mrb[22].mxu1 %vm700_vm0, %v2158_v30  ;;  %v3061_v30 = vld [vmem:[%s4483_s3 + $0x9] ss:$0 sm:$0xff] }
0x10ba   :  { %2144 = vadd.xlane.f32.xlu1 %v2143_v56 }
0x10cb   :  { %3722 = vrot.lane.b32.xlu1 %v4276_v59, %s3868_s1 }
0x10cf   :  { %3732 = vrot.lane.b32.xlu1 %v3731_v32, %s3869_s12 }
0x110a   :  { %v2136_v51 = vpop.xlane.xlu0 %2135 }
0x110e   :  { %v2133_v31 = vpop.xlane.xlu1 %2132 }
0x110f   :  { %3808 = vrcp.f32 %v2133_v31 }
0x1110   :  { %3810 = vrcp.f32 %v2136_v51 }
0x1112   :  { %v2142_v34 = vpop.xlane.xlu0 %2141  ;;  %v2139_v35 = vpop.xlane.xlu1 %2138 }
0x1113   :  { %3812 = vrcp.f32 %v2142_v34 }
0x1114   :  { %3814 = vrcp.f32 %v2139_v35 }
0x1116   :  { %v2148_v37 = vpop.xlane.xlu0 %2147  ;;  %v3718_v59 = vpop.permute.xlu1 %3717 }
0x1117   :  { %v3720_v38 = vunpack.i.h.bf16 %v3718_v59  ;;  %v3719_v46 = vunpack.i.l.bf16 %v3718_v59  ;;  %3816 = vrcp.f32 %v2148_v37 }
0x1119   :  { %v3809_v39 = vpop.eup %3808  ;;  %v3575_v40 = vpack.c.bf16 %v3720_v38, %v3719_v46 }
0x111a   :  { %v3713_v16 = vpop.permute.xlu0 %3712  ;;  %v2159_v17 = vmul.f32 %v3809_v39, %v3795_v20  ;;  %v3811_v22 = vpop.eup %3810 }
0x111b   :  { %v3715_v49 = vunpack.i.h.bf16 %v3713_v16  ;;  %v3714_v48 = vunpack.i.l.bf16 %v3713_v16  ;;  %3576 = vmatprep.subr.bf16.mxu0 %v3575_v40  ;;  %v2160_v57 = vmul.f32 %v3811_v22, %v4336_v9  ;;  %v3015_v22 = vld [vmem:[%s4485_s5 + $0x68] sm:$0xff] }
0x111c   :  { %3381 = vmatprep.mubr.msk.f32.mxu1 %vm700_vm0, %v2159_v17  ;;  %3578 = vmatpush3.bf16.msra.mxu0 %v3575_v40 }
0x111d   :  { %v3813_v52 = vpop.eup %3812  ;;  %v3571_v41 = vpack.c.bf16 %v3715_v49, %v3714_v48 }
0x111e   :  { %v3815_v53 = vpop.eup %3814  ;;  %v2162_v54 = vmul.f32 %v3813_v52, %v3799_v21  ;;  %v3728_v11 = vpop.permute.xlu0 %3727 }
0x111f   :  { %3572 = vmatprep.subr.bf16.mxu1 %v3571_v41  ;;  %v2161_v55 = vmul.f32 %v3815_v53, %v3797_v47  ;;  %v3730_v9 = vunpack.i.h.bf16 %v3728_v11  ;;  %v3729_v12 = vunpack.i.l.bf16 %v3728_v11  ;;  %v3017_v53 = vld [vmem:[%s4485_s5 + $0x78] sm:$0xff] }
0x1120   :  { %3574 = vmatpush3.bf16.msra.mxu1 %v3571_v41  ;;  %v3016_v41 = vld [vmem:[%s4485_s5 + $0x70] sm:$0xff] }
0x1121   :  { %3388 = vmatprep.mubr.msk.f32.mxu0 %vm700_vm0, %v2161_v55  ;;  %v3817_v1 = vpop.eup %3816  ;;  %v3583_v14 = vpack.c.bf16 %v3730_v9, %v3729_v12  ;;  %v3019_v9 = vld [vmem:[%s4485_s5 + $0x88] sm:$0xff] }
0x1122   :  { %3389 = vmatmul.mubr.msk.f32.vlgmr.msra.gmra.mrb[14].mxu0 %vm700_vm0, %v2162_v54  ;;  %v2164_v3 = vmul.f32 %v3817_v1, %v4343_v42  ;;  %v3595_v54 = vpack.c.bf16 %v3017_v53, %v3016_v41  ;;  %v3064_v1 = vld [vmem:[%s4483_s3 + $0xa] ss:$0 sm:$0xff] }
0x1123   :  { %3382 = vmatmul.mubr.msk.f32.vlgmr.msra.gmra.mrb[24].mxu1 %vm700_vm0, %v2160_v57  ;;  %3584 = vmatprep.subr.bf16.mxu0 %v3583_v14 }
0x1124   :  { %3586 = vmatpush3.bf16.msra.mxu0 %v3583_v14  ;;  %v3021_v14 = vld [vmem:[%s4485_s5 + $0x98] sm:$0xff] }
0x1147   :  { %v2145_v36 = vpop.xlane.xlu1 %2144 }
0x1148   :  { %3818 = vrcp.f32 %v2145_v36 }
0x114b   :  { %v3723_v58 = vpop.permute.xlu1 %3722 }
0x114c   :  { %v3725_v60 = vunpack.i.h.bf16 %v3723_v58  ;;  %v3724_v61 = vunpack.i.l.bf16 %v3723_v58 }
0x114e   :  { %v3579_v62 = vpack.c.bf16 %v3725_v60, %v3724_v61 }
0x114f   :  { %v3733_v8 = vpop.permute.xlu1 %3732 }
0x1150   :  { %3580 = vmatprep.subr.bf16.mxu1 %v3579_v62  ;;  %v3735_v10 = vunpack.i.h.bf16 %v3733_v8  ;;  %v3734_v18 = vunpack.i.l.bf16 %v3733_v8 }
0x1151   :  { %3582 = vmatpush3.bf16.msra.mxu1 %v3579_v62 }
0x1152   :  { %v3819_v2 = vpop.eup %3818  ;;  %v3587_v13 = vpack.c.bf16 %v3735_v10, %v3734_v18  ;;  %v3018_v18 = vld [vmem:[%s4485_s5 + $0x80] sm:$0xff] }
0x1153   :  { %v2163_v4 = vmul.f32 %v3819_v2, %v3803_v25  ;;  %v3599_v12 = vpack.c.bf16 %v3019_v9, %v3018_v18 }
0x1154   :  { %3588 = vmatprep.subr.bf16.mxu0 %v3587_v13 }
0x1155   :  { %3395 = vmatprep.mubr.msk.f32.mxu1 %vm700_vm0, %v2163_v4  ;;  %3590 = vmatpush3.bf16.msra.mxu0 %v3587_v13  ;;  %v3065_v4 = vld [vmem:[%s4483_s3 + $0xb] ss:$0 sm:$0xff]  ;;  %v3020_v13 = vld [vmem:[%s4485_s5 + $0x90] sm:$0xff] }
0x1156   :  { %3396 = vmatmul.mubr.msk.f32.vlgmr.msra.gmra.mrb[26].mxu1 %vm700_vm0, %v2164_v3  ;;  %3600 = vmatprep.subr.bf16.mxu0 %v3599_v12 }
0x118c   :  { %v3376_v5 = vpop.f32.mrb[22].mxu1 }
0x118d   :  { %v2243_v6 = vpop.f32.mrb[23].mxu1 }
0x11f5   :  { %v3390_v50 = vpop.f32.mrb[14].mxu0 }
0x11f6   :  { %v2417_v15 = vpop.f32.mrb[15].mxu0  ;;  %v3383_v20 = vpop.f32.mrb[24].mxu1 }
0x11f7   :  { %2517 = vrot.lane.b32.xlu1 %v3383_v20, %s3870_s13  ;;  %v2330_v44 = vpop.f32.mrb[25].mxu1  ;;  %v3023_v20 = vld [vmem:[%s4485_s5 + $0xa8] sm:$0xff] }
0x11f8   :  { %2515 = vrot.lane.b32.xlu0 %v2330_v44, %s3870_s13 }
0x11fb   :  { %2525 = vrot.lane.b32.xlu1 %v3390_v50, %s3871_s14  ;;  %v3603_v50 = vpack.c.bf16 %v3021_v14, %v3020_v13 }
0x11fc   :  { %2523 = vrot.lane.b32.xlu0 %v2417_v15, %s3871_s14  ;;  %v3022_v15 = vld [vmem:[%s4485_s5 + $0xa0] sm:$0xff] }
0x11fd   :  { %v3607_v44 = vpack.c.bf16 %v3023_v20, %v3022_v15 }
0x1229   :  { %v3397_v47 = vpop.f32.mrb[26].mxu1 }
0x122a   :  { %2533 = vrot.lane.b32.xlu1 %v3397_v47, %s3872_s15  ;;  %v2504_v21 = vpop.f32.mrb[27].mxu1  ;;  %v3024_v47 = vld [vmem:[%s4485_s5 + $0xb0] sm:$0xff] }
0x122b   :  { %2531 = vrot.lane.b32.xlu0 %v2504_v21, %s3872_s15  ;;  %v3025_v21 = vld [vmem:[%s4485_s5 + $0xb8] sm:$0xff] }
0x1269   :  { %v2518_v19 = vpop.permute.xlu1 %2517 }
0x126a   :  { %v2516_v23 = vpop.permute.xlu0 %2515  ;;  %v2538_v63 = vsel %vm335_vm12, %v3376_v5, %v2518_v19  ;;  %v3611_v19 = vpack.c.bf16 %v3025_v21, %v3024_v47 }
0x126b   :  { %v2537_v45 = vsel %vm335_vm12, %v2243_v6, %v2516_v23  ;;  %v3066_v23 = vld [vmem:[%s4483_s3 + $0xc] ss:$0 sm:$0xff] }
0x126d   :  { %v2526_v42 = vpop.permute.xlu1 %2525 }
0x126e   :  { %v2524_v43 = vpop.permute.xlu0 %2523  ;;  %v2540_v26 = vsel %vm700_vm0, %v2538_v63, %v2526_v42 }
0x126f   :  { %v2539_v24 = vsel %vm700_vm0, %v2537_v45, %v2524_v43 }
0x129c   :  { %v2534_v0 = vpop.permute.xlu1 %2533 }
0x129d   :  { %v2532_v25 = vpop.permute.xlu0 %2531  ;;  %v2542_v28 = vsel %vm1165_vm1, %v2540_v26, %v2534_v0 }
0x129e   :  { %v2541_v27 = vsel %vm1165_vm1, %v2539_v24, %v2532_v25 }
0x129f   :  { %3406 = vmatprep.mubr.msk.f32.mxu0 %vm150_vm11, %v2541_v27 }
0x12a0   :  { %3407 = vmatmul.mubr.msk.f32.vlgmr.msra.gmra.mrb[16].mxu0 %vm150_vm11, %v2542_v28 }
0x12a1   :  { %3602 = vmatpush3.bf16.msra.mxu0 %v3599_v12 }
0x12a2   :  { %3604 = vmatprep.subr.bf16.mxu0 %v3603_v50 }
0x12a5   :  { %3606 = vmatpush3.bf16.msra.mxu0 %v3603_v50  ;;  %v3069_v50 = vld [vmem:[%s4483_s3 + $0xd] ss:$0 sm:$0xff] }
0x12a6   :  { %3608 = vmatprep.subr.bf16.mxu0 %v3607_v44 }
0x12a9   :  { %3610 = vmatpush3.bf16.msra.mxu0 %v3607_v44 }
0x12aa   :  { %3612 = vmatprep.subr.bf16.mxu0 %v3611_v19 }
0x12ad   :  { %3614 = vmatpush3.bf16.msra.mxu0 %v3611_v19 }
0x1373   :  { %v3408_v56 = vpop.f32.mrb[16].mxu0 }
0x1374   :  { %v2641_v51 = vadd.f32 %v3408_v56, %v3061_v30  ;;  %v2635_v31 = vpop.f32.mrb[17].mxu0 }
0x1375   :  { %v2636_v32 = vadd.f32 %v3061_v30, %v2635_v31 }
0x1376   :  { %v2645_v33 = vadd.f32 %v2641_v51, %v4247_v29 }
0x1377   :  { %v2644_v34 = vadd.f32 %v2636_v32, %v4245_v7  ;;  %v3014_v7 = vld [vmem:[%s4485_s5 + $0x60] sm:$0xff] }
0x1378   :  { %v2649_v35 = vsel %vm150_vm11, %v2645_v33, 0.0  ;;  %v3591_v52 = vpack.c.bf16 %v3015_v22, %v3014_v7 }
0x1379   :  { %2650 = vadd.xlane.f32.xlu1 %v2649_v35  ;;  %v2646_v37 = vsel %vm150_vm11, %v2644_v34, 0.0 }
0x137a   :  { %2647 = vadd.xlane.f32.xlu0 %v2646_v37  ;;  %3592 = vmatprep.subr.bf16.mxu1 %v3591_v52 }
0x137b   :  { %3594 = vmatpush3.bf16.msra.mxu1 %v3591_v52 }
0x137c   :  { %3596 = vmatprep.subr.bf16.mxu1 %v3595_v54 }
0x137f   :  { %3598 = vmatpush3.bf16.msra.mxu1 %v3595_v54 }
0x1406   :  { %v2651_v59 = vpop.xlane.xlu1 %2650 }
0x1407   :  { %v2653_v38 = vmul.f32 0.03125, %v2651_v59  ;;  %v2648_v46 = vpop.xlane.xlu0 %2647 }
0x1408   :  { %v2652_v39 = vmul.f32 0.03125, %v2648_v46 }
0x1409   :  { %v2655_v40 = vsub.f32 %v2645_v33, %v2653_v38 }
0x140a   :  { %v2654_v16 = vsub.f32 %v2644_v34, %v2652_v39 }
0x140b   :  { %v2657_v48 = vmul.f32 %v2655_v40, %v2655_v40 }
0x140c   :  { %v2656_v17 = vmul.f32 %v2654_v16, %v2654_v16 }
0x140d   :  { %v2661_v29 = vsel %vm150_vm11, %v2657_v48, 0.0 }
0x140e   :  { %v2658_v49 = vsel %vm150_vm11, %v2656_v17, 0.0 }
0x140f   :  { %2659 = vadd.xlane.f32.xlu0 %v2658_v49 }
0x1413   :  { %2662 = vadd.xlane.f32.xlu0 %v2661_v29 }
0x149c   :  { %v2660_v55 = vpop.xlane.xlu0 %2659 }
0x149d   :  { %v2664_v57 = vmul.f32 0.03125, %v2660_v55 }
0x149f   :  { %v2666_v36 = vadd.f32 1e-05, %v2664_v57 }
0x14a0   :  { %v2663_v58 = vpop.xlane.xlu0 %2662 }
0x14a1   :  { %3820 = vrsqrt.f32 %v2666_v36  ;;  %v2665_v60 = vmul.f32 0.03125, %v2663_v58 }
0x14a3   :  { %v2667_v61 = vadd.f32 1e-05, %v2665_v60 }
0x14a5   :  { %3822 = vrsqrt.f32 %v2667_v61 }
0x14ab   :  { %v3821_v62 = vpop.eup %3820 }
0x14ac   :  { %v2670_v2 = vmul.f32 %v3821_v62, %v2654_v16 }
0x14ae   :  { %v2676_v3 = vmul.f32 %v3064_v1, %v2670_v2 }
0x14af   :  { %v3823_v5 = vpop.eup %3822 }
0x14b0   :  { %v2671_v6 = vmul.f32 %v3823_v5, %v2655_v40  ;;  %v4413_v8 = vadd.f32 %v3065_v4, %v2676_v3 }
0x14b2   :  { %v2677_v11 = vmul.f32 %v3064_v1, %v2671_v6  ;;  %3417 = vmatprep.mubr.msk.f32.mxu1 %vm150_vm11, %v4413_v8 }
0x14b4   :  { %v4417_v10 = vadd.f32 %v3065_v4, %v2677_v11 }
0x14b6   :  { %3418 = vmatmul.mubr.msk.f32.vlgmr.msra.gmra.mrb[28].mxu1 %vm150_vm11, %v4417_v10 }
0x1589   :  { %v3419_v42 = vpop.f32.mrb[28].mxu1 }
0x158a   :  { %v2766_v43 = vadd.f32 %v3419_v42, %v3066_v23  ;;  %v2760_v45 = vpop.f32.mrb[29].mxu1 }
0x158b   :  { %v2761_v0 = vadd.f32 %v3066_v23, %v2760_v45 }
0x158c   :  { %v2772_v63 = vmul.f32 0.70710677, %v2766_v43  ;;  %v2770_v12 = vmul.f32 0.5, %v2766_v43 }
0x158d   :  { %v2771_v24 = vmul.f32 0.70710677, %v2761_v0  ;;  %v2769_v18 = vmul.f32 0.5, %v2761_v0 }
0x158e   :  { %v2774_v25 = vand.u32 2147483647, %v2772_v63  ;;  %vm2814_vm4 = vcmp.ge.f32.partialorder %v2772_v63, 0.0 }
0x158f   :  { %v2773_v26 = vand.u32 2147483647, %v2771_v24  ;;  %vm2813_vm5 = vcmp.ge.f32.partialorder %v2771_v24, 0.0 }
0x1590   :  { %v2776_v27 = vmul.f32 0.3275911, %v2774_v25  ;;  %v2802_v51 = vsub.f32 0.0, %v2774_v25 }
0x1591   :  { %v2775_v28 = vmul.f32 0.3275911, %v2773_v26  ;;  %v2801_v31 = vsub.f32 0.0, %v2773_v26 }
0x1592   :  { %v2778_v30 = vadd.f32 1.0, %v2776_v27  ;;  %v2804_v33 = vmul.f32 %v2802_v51, %v2774_v25 }
0x1593   :  { %v2777_v56 = vadd.f32 1.0, %v2775_v28  ;;  %v2803_v37 = vmul.f32 %v2801_v31, %v2773_v26 }
0x1594   :  { %3824 = vrcp.f32 %v2778_v30  ;;  %v2807_v46 = vmul.f32 1.442695, %v2804_v33 }
0x1595   :  { %3826 = vrcp.f32 %v2777_v56  ;;  %v2805_v16 = vmul.f32 1.442695, %v2803_v37 }
0x1596   :  { %3828 = vpow2.f32 %v2807_v46 }
0x1597   :  { %3830 = vpow2.f32 %v2805_v16 }
0x159e   :  { %v3825_v32 = vpop.eup %3824 }
0x159f   :  { %v3827_v34 = vpop.eup %3826  ;;  %v2784_v35 = vmul.f32 1.0614054, %v3825_v32 }
0x15a0   :  { %v2783_v59 = vmul.f32 1.0614054, %v3827_v34  ;;  %v3829_v36 = vpop.eup %3828 }
0x15a1   :  { %v2786_v38 = vadd.f32 -1.4531521, %v2784_v35  ;;  %v3831_v60 = vpop.eup %3830 }
0x15a2   :  { %v2785_v39 = vadd.f32 -1.4531521, %v2783_v59 }
0x15a3   :  { %v2788_v40 = vmul.f32 %v3825_v32, %v2786_v38  ;;  %v3073_v38 = vld [vmem:[%s4483_s3 + $0xf] ss:$0 sm:$0xff] }
0x15a4   :  { %v2787_v17 = vmul.f32 %v3827_v34, %v2785_v39 }
0x15a5   :  { %v2790_v49 = vadd.f32 1.4214138, %v2788_v40 }
0x15a6   :  { %v2789_v48 = vadd.f32 1.4214138, %v2787_v17 }
0x15a7   :  { %v2792_v29 = vmul.f32 %v3825_v32, %v2790_v49 }
0x15a8   :  { %v2791_v7 = vmul.f32 %v3827_v34, %v2789_v48 }
0x15a9   :  { %v2794_v22 = vadd.f32 -0.28449672, %v2792_v29 }
0x15aa   :  { %v2793_v52 = vadd.f32 -0.28449672, %v2791_v7 }
0x15ab   :  { %v2796_v41 = vmul.f32 %v3825_v32, %v2794_v22 }
0x15ac   :  { %v2795_v53 = vmul.f32 %v3827_v34, %v2793_v52 }
0x15ad   :  { %v2798_v54 = vadd.f32 0.2548296, %v2796_v41 }
0x15ae   :  { %v2797_v55 = vadd.f32 0.2548296, %v2795_v53 }
0x15af   :  { %v2800_v57 = vmul.f32 %v3825_v32, %v2798_v54 }
0x15b0   :  { %v2799_v58 = vmul.f32 %v3827_v34, %v2797_v55  ;;  %v3072_v34 = vld [vmem:[%s4483_s3 + $0xe] ss:$0 sm:$0xff] }
0x15b1   :  { %v2810_v61 = vmul.f32 %v3829_v36, %v2800_v57 }
0x15b2   :  { %v2809_v62 = vmul.f32 %v3831_v60, %v2799_v58 }
0x15b3   :  { %v2812_v1 = vsub.f32 1.0, %v2810_v61 }
0x15b4   :  { %v2811_v2 = vsub.f32 1.0, %v2809_v62 }
0x15b5   :  { %v2816_v4 = vsub.f32 0.0, %v2812_v1 }
0x15b6   :  { %v2815_v3 = vsub.f32 0.0, %v2811_v2 }
0x15b7   :  { %v2818_v5 = vsel %vm2814_vm4, %v2812_v1, %v2816_v4 }
0x15b8   :  { %v2820_v6 = vadd.f32 1.0, %v2818_v5  ;;  %v2817_v11 = vsel %vm2813_vm5, %v2811_v2, %v2815_v3 }
0x15b9   :  { %v2819_v9 = vadd.f32 1.0, %v2817_v11 }
0x15ba   :  { %v2822_v14 = vmul.f32 %v2820_v6, %v2770_v12 }
0x15bb   :  { %v2821_v13 = vmul.f32 %v2819_v9, %v2769_v18 }
0x15bd   :  { %3436 = vmatprep.mubr.msk.f32.mxu0 %vm66_vm9, %v2821_v13 }
0x15be   :  { %3437 = vmatmul.mubr.msk.f32.vlgmr.msra.gmra.mrb[18].mxu0 %vm66_vm9, %v2822_v14 }
0x1691   :  { %v3438_v15 = vpop.f32.mrb[18].mxu0 }
0x1692   :  { %v2905_v20 = vadd.f32 %v3438_v15, %v3069_v50  ;;  %v2899_v44 = vpop.f32.mrb[19].mxu0 }
0x1693   :  { %v2900_v47 = vadd.f32 %v3069_v50, %v2899_v44 }
0x1694   :  { %v2909_v21 = vadd.f32 %v2905_v20, %v4417_v10 }
0x1695   :  { %v2908_v19 = vadd.f32 %v2900_v47, %v4413_v8 }
0x1696   :  { %v2913_v23 = vsel %vm150_vm11, %v2909_v21, 0.0 }
0x1697   :  { %2914 = vadd.xlane.f32.xlu0 %v2913_v23  ;;  %v2910_v42 = vsel %vm150_vm11, %v2908_v19, 0.0 }
0x1698   :  { %2911 = vadd.xlane.f32.xlu1 %v2910_v42 }
0x1724   :  { %v2915_v43 = vpop.xlane.xlu0 %2914 }
0x1725   :  { %v2917_v45 = vmul.f32 0.03125, %v2915_v43  ;;  %v2912_v0 = vpop.xlane.xlu1 %2911 }
0x1726   :  { %v2916_v63 = vmul.f32 0.03125, %v2912_v0 }
0x1727   :  { %v2919_v24 = vsub.f32 %v2909_v21, %v2917_v45 }
0x1728   :  { %v2918_v25 = vsub.f32 %v2908_v19, %v2916_v63 }
0x1729   :  { %v2921_v26 = vmul.f32 %v2919_v24, %v2919_v24 }
0x172a   :  { %v2920_v27 = vmul.f32 %v2918_v25, %v2918_v25 }
0x172b   :  { %v2925_v28 = vsel %vm150_vm11, %v2921_v26, 0.0 }
0x172c   :  { %2926 = vadd.xlane.f32.xlu0 %v2925_v28  ;;  %v2922_v10 = vsel %vm150_vm11, %v2920_v27, 0.0 }
0x172d   :  { %2923 = vadd.xlane.f32.xlu1 %v2922_v10 }
0x17b9   :  { %v2927_v8 = vpop.xlane.xlu0 %2926 }
0x17ba   :  { %v2929_v30 = vmul.f32 0.03125, %v2927_v8  ;;  %v2924_v56 = vpop.xlane.xlu1 %2923 }
0x17bb   :  { %v2928_v51 = vmul.f32 0.03125, %v2924_v56 }
0x17bc   :  { %v2931_v31 = vadd.f32 1e-05, %v2929_v30 }
0x17bd   :  { %v2930_v32 = vadd.f32 1e-05, %v2928_v51 }
0x17be   :  { %3832 = vrsqrt.f32 %v2931_v31 }
0x17bf   :  { %3834 = vrsqrt.f32 %v2930_v32 }
0x17c8   :  { %v3833_v33 = vpop.eup %3832 }
0x17c9   :  { %v3835_v35 = vpop.eup %3834  ;;  %v2935_v37 = vmul.f32 %v3833_v33, %v2919_v24 }
0x17ca   :  { %v2934_v59 = vmul.f32 %v3835_v35, %v2918_v25 }
0x17cb   :  { %v2941_v46 = vmul.f32 %v3072_v34, %v2935_v37 }
0x17cc   :  { %v2940_v39 = vmul.f32 %v3072_v34, %v2934_v59 }
0x17cd   :  { %v2947_v40 = vadd.f32 %v3073_v38, %v2941_v46 }
0x17ce   :  { %v2946_v16 = vadd.f32 %v3073_v38, %v2940_v39 }
0x17cf   :  { %2949 = vst.msk [vmem:[#allocation2 + $0x8] sm:$0xff] %vm150_vm11, %v2947_v40 }
0x17d0   :  { %2948 = vst.msk [vmem:[#allocation2] sm:$0xff] %vm150_vm11, %v2946_v16 }
0x17d1   :  { %3847 = shalt.err (!%p3844_p4)
}
0x17d2   :  { %s3848_s11 = scalar_lea.hbm %s4486_s6, 256 }
0x17d3   :  { %p3849_p5 = scmp.ne.s32.totalorder %s4486_s6, %s3848_s11  ;;  %p3852_p6 = scmp.lt.u32.totalorder %s3848_s11, %s4486_s6 }
0x17d5   :  { %p3854_p7 = pnand %p3852_p6, %p3849_p5 }
0x17d7   :  { %3857 = shalt.err (!%p3854_p7)
}
0x17d8   :  { %s3874_s20 = smov 128  }
0x17d9   :  { %2961 = dma.vmem_to_hbm [thread:$0]  %s2956_s0, 256, %s4486_s6, [#allocation3], %s3874_s20, %s3874_s20, %s3870_s13  }
0x17da   :  { %3858 = dma.done.wait [#allocation3], 256  }
0x17db   :  { %3859 = vsyncadd [#allocation3], 4294967040 }
0x17dc   :  { %2965 = vsyncpa [#allocation3], 1 }

</bundles_post_ra>
